<compile_context>
chip_gen: v6e
topology: v6e:2x2x1
jax: 0.10.0
libtpu: 0.0.40
codegen_flags: <defaults>
</compile_context>

<pallas_src>
import functools

import jax
import jax.numpy as jnp
from jax.experimental import pallas as pl
from jax.experimental.pallas import tpu as pltpu

C_STEM = 48       # tf_efficientnet_b4 stem width
C_PAD = 128       # stem channels padded to one full lane width (zeros beyond C_STEM)
FEAT = 1000       # backbone classifier output features
FEAT_PAD = 1024   # padded to a multiple of 128 lanes
N_HEADS = 8       # 3 (age) + 3 (mask) + 2 (sex) concatenated head outputs
HEAD_PAD = 128    # fused head output padded to one full lane width


def _round_up(x, m):
    return (x + m - 1) // m * m


# ------------------------------------------------------------------
# Pallas kernels
# ------------------------------------------------------------------
def _stem_silu_gap_kernel(x_ref, w_ref, b_ref, o_ref, *, hw_total, hw_tile, inv_hw):
    """Fused stem conv (im2col matmul) + folded BN + SiLU + global average pool.

    grid = (B, n_hw_tiles).  The (1, 1, C_PAD) output block is resident across the
    HW grid axis and is used directly as the pooling accumulator (init on the first
    HW step, scale by 1/HW on the last).  The stem activation never touches HBM.
    """
    h = pl.program_id(1)

    @pl.when(h == 0)
    def _():
        o_ref[...] = jnp.zeros_like(o_ref)

    x = x_ref[0]                                                    # (hw_tile, K)
    acc = jnp.dot(x, w_ref[...], preferred_element_type=jnp.float32) + b_ref[...]
    act = acc * jax.nn.sigmoid(acc)                                 # SiLU

    if hw_total % hw_tile:   # static check: mask zero-padded tail rows (SiLU(bias)!=0)
        row = h * hw_tile + jax.lax.broadcasted_iota(jnp.int32, (hw_tile, 1), 0)
        act = jnp.where(row < hw_total, act, 0.0)

    o_ref[...] += jnp.sum(act, axis=0, keepdims=True)[None]

    @pl.when(h == pl.num_programs(1) - 1)
    def _():
        o_ref[...] = o_ref[...] * inv_hw


def _cls_heads_kernel(p_ref, cw_ref, cb_ref, hw_ref, hb_ref, o_ref):
    """Fused backbone classifier + 3 heads (single launch, single lane-dense store).

    The PyTorch module averages 5 multi-sample-dropout evaluations per head; with
    Dropout in eval mode every sample is identical, so the average equals a single
    evaluation (exact eval-mode semantics).
    """
    feats = jnp.dot(p_ref[...], cw_ref[...],
                    preferred_element_type=jnp.float32) + cb_ref[...]   # (B, FEAT_PAD)
    out = jnp.dot(feats, hw_ref[...],
                  preferred_element_type=jnp.float32) + hb_ref[...]     # (B, HEAD_PAD)
    o_ref[...] = out.astype(o_ref.dtype)


# ------------------------------------------------------------------
# pallas_call wrappers
# ------------------------------------------------------------------
def _full_spec(shape):
    nd = len(shape)
    return pl.BlockSpec(shape, lambda *_: (0,) * nd)


def _stem_silu_gap(patches, w, b, hw_total, hw_tile):
    """patches: (B, hw_pad, K) zero-padded im2col; returns pooled (B, C_PAD)."""
    B, hw_pad, K = patches.shape
    n_hw = hw_pad // hw_tile
    kernel = functools.partial(_stem_silu_gap_kernel, hw_total=hw_total,
                               hw_tile=hw_tile, inv_hw=1.0 / float(hw_total))
    pooled3 = pl.pallas_call(
        kernel,
        out_shape=jax.ShapeDtypeStruct((B, 1, C_PAD), jnp.float32),
        grid=(B, n_hw),
        in_specs=[
            # LHS tiled over M (double-buffered by the Pallas pipeline)
            pl.BlockSpec((1, hw_tile, K), lambda bi, hi: (bi, hi, 0)),
            # weight / bias constant across the grid -> stay resident in VMEM
            pl.BlockSpec((K, C_PAD), lambda bi, hi: (0, 0)),
            pl.BlockSpec((1, C_PAD), lambda bi, hi: (0, 0)),
        ],
        out_specs=pl.BlockSpec((1, 1, C_PAD), lambda bi, hi: (bi, 0, 0)),
        compiler_params=pltpu.CompilerParams(
            # batch sharded across TensorCores (v7x megacore); HW is the reduction
            dimension_semantics=("parallel", "arbitrary"),
            # explicit, with large headroom: per-step working set is < 1 MiB
            vmem_limit_bytes=32 * 1024 * 1024,
        ),
    )(patches, w, b)
    return pooled3.reshape(B, C_PAD)


def _cls_heads(pooled, cls_w, cls_b, head_w, head_b):
    B = pooled.shape[0]
    return pl.pallas_call(
        _cls_heads_kernel,
        out_shape=jax.ShapeDtypeStruct((B, HEAD_PAD), jnp.float32),
        in_specs=[_full_spec(a.shape) for a in (pooled, cls_w, cls_b, head_w, head_b)],
        out_specs=_full_spec((B, HEAD_PAD)),
        compiler_params=pltpu.CompilerParams(vmem_limit_bytes=32 * 1024 * 1024),
    )(pooled, cls_w, cls_b, head_w, head_b)


# ------------------------------------------------------------------
# Parameter init (deterministic, synthetic)
# ------------------------------------------------------------------
def init_params(key):
    ks = jax.random.split(key, 10)
    p = {}
    # stem conv weight, PyTorch OIHW layout (Cout, Cin, kh, kw); BN folded to gamma/beta
    p["stem_w"] = 0.1 * jax.random.normal(ks[0], (C_STEM, 3, 3, 3), jnp.float32)
    p["stem_gamma"] = jnp.ones((C_STEM,), jnp.float32)
    p["stem_beta"] = 0.01 * jax.random.normal(ks[1], (C_STEM,), jnp.float32)
    # backbone classifier, PyTorch Linear layout (out, in)
    p["cls_w"] = 0.05 * jax.random.normal(ks[2], (FEAT, C_STEM), jnp.float32)
    p["cls_b"] = 0.01 * jax.random.normal(ks[3], (FEAT,), jnp.float32)
    # heads
    p["age_w"] = 0.02 * jax.random.normal(ks[4], (3, FEAT), jnp.float32)
    p["age_b"] = 0.01 * jax.random.normal(ks[5], (3,), jnp.float32)
    p["mask_w"] = 0.02 * jax.random.normal(ks[6], (3, FEAT), jnp.float32)
    p["mask_b"] = 0.01 * jax.random.normal(ks[7], (3,), jnp.float32)
    p["sex_w"] = 0.02 * jax.random.normal(ks[8], (2, FEAT), jnp.float32)
    p["sex_b"] = 0.01 * jax.random.normal(ks[9], (2,), jnp.float32)
    return p


# ------------------------------------------------------------------
# Forward pass
# ------------------------------------------------------------------
def efficientnet_custom_forward(params, x_nchw):
    B, Cin, H, W = x_nchw.shape
    x = jnp.transpose(x_nchw, (0, 2, 3, 1))                        # NCHW -> NHWC

    # ---- stem 3x3, stride 2, pad 1 conv as im2col (XLA-side gather) ----
    # TODO(synk): in-kernel im2col (9-tap grid axis over padded NHWC) not implemented;
    #             second-order per review since the stem activation round trip is gone.
    xp = jnp.pad(x, ((0, 0), (1, 1), (1, 1), (0, 0)))
    Ho, Wo = H // 2, W // 2
    HW = Ho * Wo
    patches = jnp.concatenate(
        [xp[:, ky:ky + 2 * Ho:2, kx:kx + 2 * Wo:2, :]
         for ky in range(3) for kx in range(3)], axis=-1)          # (B,Ho,Wo,9*Cin)
    K = 9 * Cin
    patches = patches.reshape(B, HW, K)

    # tile over M; biggest reasonable tile, zero-pad HW to a multiple of the tile
    hw_tile = min(1024, _round_up(HW, 8))
    hw_pad = _round_up(HW, hw_tile)
    if hw_pad != HW:
        patches = jnp.pad(patches, ((0, 0), (0, hw_pad - HW), (0, 0)))

    # conv weight OIHW -> (kh,kw,Cin,Cout) -> (K, C_STEM); fold BN gamma; pad to 128 lanes.
    # TODO(synk): faithful folded-BN (running_mean / sqrt(var+eps)) not modeled for the
    #             synthetic stand-in backbone.
    w2d = jnp.transpose(params["stem_w"], (2, 3, 1, 0)).reshape(K, C_STEM)
    w2d = w2d * params["stem_gamma"][None, :]
    w2d = jnp.pad(w2d, ((0, 0), (0, C_PAD - C_STEM)))
    b2d = jnp.pad(params["stem_beta"], (0, C_PAD - C_STEM))[None, :]

    # ---- fused stem matmul + SiLU + global-average-pool (single Pallas launch) ----
    pooled = _stem_silu_gap(patches, w2d, b2d, HW, hw_tile)        # (B, C_PAD)

    # ---- fused classifier (padded 1024 lanes) + concatenated heads (single launch) ----
    cls_w = jnp.pad(params["cls_w"].T,
                    ((0, C_PAD - C_STEM), (0, FEAT_PAD - FEAT)))   # (C_PAD, FEAT_PAD)
    cls_b = jnp.pad(params["cls_b"], (0, FEAT_PAD - FEAT))[None, :]
    head_w = jnp.concatenate(
        [params["age_w"], params["mask_w"], params["sex_w"]], axis=0).T  # (FEAT, 8)
    head_w = jnp.pad(head_w, ((0, FEAT_PAD - FEAT), (0, HEAD_PAD - N_HEADS)))
    head_b = jnp.pad(
        jnp.concatenate([params["age_b"], params["mask_b"], params["sex_b"]]),
        (0, HEAD_PAD - N_HEADS))[None, :]

    out = _cls_heads(pooled, cls_w, cls_b, head_w, head_b)         # (B, HEAD_PAD)
    age, mask, sex = out[:, 0:3], out[:, 3:6], out[:, 6:8]
    return age, mask, sex


# ------------------------------------------------------------------
if __name__ == "__main__":
    key = jax.random.PRNGKey(0)
    pkey, xkey = jax.random.split(key)
    params = init_params(pkey)

    # small NCHW input consistent with the module (3-channel image)
    x = jax.random.normal(xkey, (2, 3, 32, 32), jnp.float32)

    fwd = jax.jit(lambda xx: efficientnet_custom_forward(params, xx))
    age, mask, sex = fwd(x)
    jax.block_until_ready((age, mask, sex))

    assert age.shape == (2, 3) and age.dtype == jnp.float32
    assert mask.shape == (2, 3) and mask.dtype == jnp.float32
    assert sex.shape == (2, 2) and sex.dtype == jnp.float32
    assert bool(jnp.all(jnp.isfinite(age))) and bool(jnp.all(jnp.isfinite(mask))) \
        and bool(jnp.all(jnp.isfinite(sex)))

    print("KERNEL_OK")
</pallas_src>

<mosaic_0001>
module attributes {stable_mosaic.version = 11 : i64} {
  func.func @_cls_heads_kernel(%arg0: memref<2x128xf32, #tpu.memory_space<vmem>>, %arg1: memref<128x1024xf32, #tpu.memory_space<vmem>>, %arg2: memref<1x1024xf32, #tpu.memory_space<vmem>>, %arg3: memref<1024x128xf32, #tpu.memory_space<vmem>>, %arg4: memref<1x128xf32, #tpu.memory_space<vmem>>, %arg5: memref<2x128xf32, #tpu.memory_space<vmem>>) attributes {dimension_semantics = [], scalar_prefetch = 0 : i64, scratch_operands = 0 : i64, tpu.core_type = #tpu.core_type<tc>} {
    %c0 = arith.constant 0 : index
    %c0_0 = arith.constant 0 : index
    %0 = vector.load %arg0[%c0, %c0_0] : memref<2x128xf32, #tpu.memory_space<vmem>>, vector<2x128xf32>
    %c0_1 = arith.constant 0 : index
    %c0_2 = arith.constant 0 : index
    %1 = vector.load %arg1[%c0_1, %c0_2] : memref<128x1024xf32, #tpu.memory_space<vmem>>, vector<128x1024xf32>
    %cst = arith.constant dense<0.000000e+00> : vector<2x1024xf32>
    %2 = tpu.matmul %0, %1, %cst {dimension_numbers = #tpu.dot_dimension_numbers<[1], [0], [0], [1], [0, 0, 1, 1], [], []>} : vector<2x128xf32>, vector<128x1024xf32>, vector<2x1024xf32> -> vector<2x1024xf32>
    %c0_3 = arith.constant 0 : index
    %c0_4 = arith.constant 0 : index
    %3 = vector.load %arg2[%c0_3, %c0_4] : memref<1x1024xf32, #tpu.memory_space<vmem>>, vector<1x1024xf32>
    %4 = vector.broadcast %3 : vector<1x1024xf32> to vector<2x1024xf32>
    %5 = arith.addf %2, %4 : vector<2x1024xf32>
    %c0_5 = arith.constant 0 : index
    %c0_6 = arith.constant 0 : index
    %6 = vector.load %arg3[%c0_5, %c0_6] : memref<1024x128xf32, #tpu.memory_space<vmem>>, vector<1024x128xf32>
    %cst_7 = arith.constant dense<0.000000e+00> : vector<2x128xf32>
    %7 = tpu.matmul %5, %6, %cst_7 {dimension_numbers = #tpu.dot_dimension_numbers<[1], [0], [0], [1], [0, 0, 1, 1], [], []>} : vector<2x1024xf32>, vector<1024x128xf32>, vector<2x128xf32> -> vector<2x128xf32>
    %c0_8 = arith.constant 0 : index
    %c0_9 = arith.constant 0 : index
    %8 = vector.load %arg4[%c0_8, %c0_9] : memref<1x128xf32, #tpu.memory_space<vmem>>, vector<1x128xf32>
    %9 = vector.broadcast %8 : vector<1x128xf32> to vector<2x128xf32>
    %10 = arith.addf %7, %9 : vector<2x128xf32>
    %c0_10 = arith.constant 0 : index
    %c0_11 = arith.constant 0 : index
    %11 = vector.load %arg5[%c0_10, %c0_11] : memref<2x128xf32, #tpu.memory_space<vmem>>, vector<2x128xf32>
    tpu.vector_store %arg5[%c0_10, %c0_11], %10 {strides = array<i32>} : memref<2x128xf32, #tpu.memory_space<vmem>>, vector<2x128xf32>,
    return
  }
}

module attributes {stable_mosaic.version = 11 : i64} {
  func.func @_stem_silu_gap_kernel(%arg0: i32, %arg1: i32, %arg2: memref<1x256x27xf32, #tpu.memory_space<vmem>>, %arg3: memref<27x128xf32, #tpu.memory_space<vmem>>, %arg4: memref<1x128xf32, #tpu.memory_space<vmem>>, %arg5: memref<1x1x128xf32, #tpu.memory_space<vmem>>) attributes {dimension_semantics = [#tpu.dimension_semantics<parallel>, #tpu.dimension_semantics<arbitrary>], iteration_bounds = array<i64: 2, 1>, scalar_prefetch = 0 : i64, scratch_operands = 0 : i64, tpu.core_type = #tpu.core_type<tc>, window_params = [{transform_indices = @transform_0, window_bounds = array<i64: 1, 256, 27>}, {pipeline_mode = #tpu.pipeline_mode<synchronous>, transform_indices = @transform_1, window_bounds = array<i64: 27, 128>}, {pipeline_mode = #tpu.pipeline_mode<synchronous>, transform_indices = @transform_2, window_bounds = array<i64: 1, 128>}, {transform_indices = @transform_3, window_bounds = array<i64: 1, 1, 128>}]} {
    %c0_i32 = arith.constant 0 : i32
    %0 = arith.cmpi eq, %arg1, %c0_i32 : i32
    %1 = arith.extui %0 : i1 to i32
    %c0_i32_0 = arith.constant 0 : i32
    %2 = arith.cmpi ne, %1, %c0_i32_0 : i32
    scf.if %2 {
      %cst_17 = arith.constant 0.000000e+00 : f32
      %25 = vector.broadcast %cst_17 : f32 to vector<1x1x128xf32>
      %c0_18 = arith.constant 0 : index
      %c0_19 = arith.constant 0 : index
      %c0_20 = arith.constant 0 : index
      %26 = vector.load %arg5[%c0_18, %c0_19, %c0_20] : memref<1x1x128xf32, #tpu.memory_space<vmem>>, vector<1x1x128xf32>
      tpu.vector_store %arg5[%c0_18, %c0_19, %c0_20], %25 {strides = array<i32>} : memref<1x1x128xf32, #tpu.memory_space<vmem>>, vector<1x1x128xf32>,
    } else {
    }
    %c0 = arith.constant 0 : index
    %c0_1 = arith.constant 0 : index
    %c0_2 = arith.constant 0 : index
    %3 = vector.load %arg2[%c0, %c0_1, %c0_2] : memref<1x256x27xf32, #tpu.memory_space<vmem>>, vector<1x256x27xf32>
    %4 = vector.shape_cast %3 : vector<1x256x27xf32> to vector<256x27xf32>
    %c0_3 = arith.constant 0 : index
    %c0_4 = arith.constant 0 : index
    %5 = vector.load %arg3[%c0_3, %c0_4] : memref<27x128xf32, #tpu.memory_space<vmem>>, vector<27x128xf32>
    %cst = arith.constant dense<0.000000e+00> : vector<256x128xf32>
    %6 = tpu.matmul %4, %5, %cst {dimension_numbers = #tpu.dot_dimension_numbers<[1], [0], [0], [1], [0, 0, 1, 1], [], []>} : vector<256x27xf32>, vector<27x128xf32>, vector<256x128xf32> -> vector<256x128xf32>
    %c0_5 = arith.constant 0 : index
    %c0_6 = arith.constant 0 : index
    %7 = vector.load %arg4[%c0_5, %c0_6] : memref<1x128xf32, #tpu.memory_space<vmem>>, vector<1x128xf32>
    %8 = vector.broadcast %7 : vector<1x128xf32> to vector<256x128xf32>
    %9 = arith.addf %6, %8 : vector<256x128xf32>
    %10 = arith.negf %9 : vector<256x128xf32>
    %11 = math.exp %10 : vector<256x128xf32>
    %cst_7 = arith.constant 1.000000e+00 : f32
    %12 = vector.broadcast %cst_7 : f32 to vector<256x128xf32>
    %13 = arith.addf %12, %11 : vector<256x128xf32>
    %14 = arith.divf %12, %13 : vector<256x128xf32>
    %15 = arith.mulf %9, %14 : vector<256x128xf32>
    %c0_8 = arith.constant 0 : index
    %c0_9 = arith.constant 0 : index
    %c0_10 = arith.constant 0 : index
    %16 = vector.load %arg5[%c0_8, %c0_9, %c0_10] : memref<1x1x128xf32, #tpu.memory_space<vmem>>, vector<1x1x128xf32>
    %cst_11 = arith.constant dense<0.000000e+00> : vector<128xf32>
    %17 = vector.multi_reduction <add>, %15, %cst_11 [0] : vector<256x128xf32> to vector<128xf32>
    %18 = vector.shape_cast %17 : vector<128xf32> to vector<1x128xf32>
    %19 = vector.shape_cast %18 : vector<1x128xf32> to vector<1x1x128xf32>
    %20 = arith.addf %16, %19 : vector<1x1x128xf32>
    %c0_12 = arith.constant 0 : index
    %c0_13 = arith.constant 0 : index
    %c0_14 = arith.constant 0 : index
    %21 = vector.load %arg5[%c0_12, %c0_13, %c0_14] : memref<1x1x128xf32, #tpu.memory_space<vmem>>, vector<1x1x128xf32>
    tpu.vector_store %arg5[%c0_12, %c0_13, %c0_14], %20 {strides = array<i32>} : memref<1x1x128xf32, #tpu.memory_space<vmem>>, vector<1x1x128xf32>,
    %c0_i32_15 = arith.constant 0 : i32
    %22 = arith.cmpi eq, %arg1, %c0_i32_15 : i32
    %23 = arith.extui %22 : i1 to i32
    %c0_i32_16 = arith.constant 0 : i32
    %24 = arith.cmpi ne, %23, %c0_i32_16 : i32
    scf.if %24 {
      %c0_17 = arith.constant 0 : index
      %c0_18 = arith.constant 0 : index
      %c0_19 = arith.constant 0 : index
      %25 = vector.load %arg5[%c0_17, %c0_18, %c0_19] : memref<1x1x128xf32, #tpu.memory_space<vmem>>, vector<1x1x128xf32>
      %cst_20 = arith.constant 3.906250e-03 : f32
      %26 = vector.broadcast %cst_20 : f32 to vector<1x1x128xf32>
      %27 = arith.mulf %25, %26 : vector<1x1x128xf32>
      %c0_21 = arith.constant 0 : index
      %c0_22 = arith.constant 0 : index
      %c0_23 = arith.constant 0 : index
      %28 = vector.load %arg5[%c0_21, %c0_22, %c0_23] : memref<1x1x128xf32, #tpu.memory_space<vmem>>, vector<1x1x128xf32>
      tpu.vector_store %arg5[%c0_21, %c0_22, %c0_23], %27 {strides = array<i32>} : memref<1x1x128xf32, #tpu.memory_space<vmem>>, vector<1x1x128xf32>,
    } else {
    }
    return
  }
  func.func @transform_0(%arg0: i32, %arg1: i32) -> (i32, i32, i32) {
    %c0_i32 = arith.constant 0 : i32
    %c0_i32_0 = arith.constant 0 : i32
    return %arg0, %arg1, %c0_i32 : i32, i32, i32
  }
  func.func @transform_1(%arg0: i32, %arg1: i32) -> (i32, i32) {
    %c0_i32 = arith.constant 0 : i32
    %c0_i32_0 = arith.constant 0 : i32
    %c0_i32_1 = arith.constant 0 : i32
    return %c0_i32, %c0_i32_0 : i32, i32
  }
  func.func @transform_2(%arg0: i32, %arg1: i32) -> (i32, i32) {
    %c0_i32 = arith.constant 0 : i32
    %c0_i32_0 = arith.constant 0 : i32
    %c0_i32_1 = arith.constant 0 : i32
    return %c0_i32, %c0_i32_0 : i32, i32
  }
  func.func @transform_3(%arg0: i32, %arg1: i32) -> (i32, i32, i32) {
    %c0_i32 = arith.constant 0 : i32
    %c0_i32_0 = arith.constant 0 : i32
    %c0_i32_1 = arith.constant 0 : i32
    return %arg0, %c0_i32, %c0_i32_0 : i32, i32, i32
  }
}

</mosaic_0001>

<bundles_post_ra>
// kernel: _lambda_.2
= control target key start
LH: loop header
LB: loop body
LE: loop exit
PB: predicated region body
PF: predicated region fallthrough
CT: control target
= control target key end

     0   :  { %s1274_s12 = smov 0   ;;  %s1276_s13 = smov 0   ;;  %s1585_s0 = inlined_call_operand.vmem [shape: f32[2,256,27], index: 0, kind: input, shape index: {}]   ;;  %s1586_s1 = inlined_call_operand.vmem [shape: f32[27,128], index: 1, kind: input, shape index: {}]   ;;  %s1587_s2 = inlined_call_operand.vmem [shape: f32[1,128], index: 2, kind: input, shape index: {}]   ;;  %s1588_s3 = inlined_call_operand.vmem [shape: f32[2,1,128], index: 3, kind: output, shape index: {}]  }
   0x1   :  { %s1278_s14 = smov 0  }
   0x2 LB: > { %s25_s15 = sadd.s32 1, %s1247_s13  ;;  %p904_p0 = scmp.ge.s32.totalorder %s1251_s14, 1  ;;  %s1251_s14 = sphi %s1278_s14, %s13_s14   ;;  %s1247_s13 = sphi %s1276_s13, %s1590_s13   ;;  %s1243_s12 = sphi %s1274_s12, %s1589_s12  }
   0x3   : > { %p27_p1 = scmp.ge.s32.totalorder %s25_s15, 2  ;;  %p156_p2 = scmp.lt.s32.totalorder %s1251_s14, 3 }
   0x5   : > { %s1592_s15 = smov (%p27_p1, %s25_s15), 0  ;;  %p157_p3 = pnand %p904_p0, %p156_p2 }
   0x6   : > { %p183_p4 = scmp.lt.s32.totalorder (!%p157_p3), %s1243_s12, 1 }
   0x7   : > { %160 = sbr.rel (%p157_p3) target bundleno = 354 (0x162), region = 32 }
   0xc   : > { %v235_v0 = vld [vmem:[%s1586_s1 + $0x18] sm:$0x7]  ;;  %vm340_vm0 = vcmask 1042432   ;;  %v234_v1 = vld [vmem:[%s1586_s1 + $0x10] sm:$0xff]  ;;  %v233_v2 = vld [vmem:[%s1586_s1 + $0x8] sm:$0xff]  ;;  %s1594_s12 = smov (!%p183_p4, %s1243_s12), 1 }
   0xd   : > { %1012 = vmatprep.subr.msk.mxu0 %vm340_vm0, %v235_v0  ;;  %1068 = vmatprep.subr.msk.mxu1 %vm340_vm0, %v235_v0  ;;  %v232_v3 = vld [vmem:[%s1586_s1] sm:$0xff]  ;;  %s975_s24 = sshll.u32 %s1594_s12, 8  ;;  %vm243_vm1 = vcmask 220160   ;;  %s1380_s30 = scalar_lea.vmem %s1588_s3, %s1594_s12  ;;  %v1253_v36 = vmov 0.0  }
   0xe   : > { %1013 = vmatpush3.msk.msra.mxu0 %vm340_vm0, %v235_v0  ;;  %1072 = vmatpush3.msk.msra.mxu1 %vm340_vm0, %v235_v0  ;;  %s1310_s27 = scalar_lea.vmem %s1585_s0, %s975_s24  ;;  %199 = vst [vmem:[%s1380_s30] sm:$0x1] %v1253_v36  ;;  %v1386_v37 = vld [vmem:[%s1587_s2] ss:$0 sm:$0xff] }
   0xf   : > { %1014 = vmatprep.subr.mxu0 %v234_v1  ;;  %1069 = vmatprep.subr.mxu1 %v234_v1  ;;  %v200_v4 = vld [vmem:[%s1310_s27] sm:$0xff]  ;;  %v201_v6 = vld [vmem:[%s1310_s27 + $0x8] sm:$0xff]  ;;  %v202_v8 = vld [vmem:[%s1310_s27 + $0x10] sm:$0xff] }
  0x10   : > { %1015 = vmatpush3.msra.mxu0 %v234_v1  ;;  %1073 = vmatpush3.msra.mxu1 %v234_v1  ;;  %v216_v5 = vld [vmem:[%s1310_s27 + $0x80] sm:$0xff]  ;;  %v217_v7 = vld [vmem:[%s1310_s27 + $0x88] sm:$0xff]  ;;  %v218_v9 = vld [vmem:[%s1310_s27 + $0x90] sm:$0xff] }
  0x11   : > { %1016 = vmatprep.subr.mxu0 %v233_v2  ;;  %1070 = vmatprep.subr.mxu1 %v233_v2  ;;  %v203_v10 = vld [vmem:[%s1310_s27 + $0x18] sm:$0xff]  ;;  %v204_v12 = vld [vmem:[%s1310_s27 + $0x20] sm:$0xff]  ;;  %v205_v14 = vld [vmem:[%s1310_s27 + $0x28] sm:$0xff] }
  0x12   : > { %1017 = vmatpush3.msra.mxu0 %v233_v2  ;;  %1074 = vmatpush3.msra.mxu1 %v233_v2  ;;  %v219_v11 = vld [vmem:[%s1310_s27 + $0x98] sm:$0xff]  ;;  %v220_v13 = vld [vmem:[%s1310_s27 + $0xa0] sm:$0xff]  ;;  %v221_v15 = vld [vmem:[%s1310_s27 + $0xa8] sm:$0xff] }
  0x13   : > { %1018 = vmatprep.subr.mxu0 %v232_v3  ;;  %1071 = vmatprep.subr.mxu1 %v232_v3  ;;  %v206_v16 = vld [vmem:[%s1310_s27 + $0x30] sm:$0xff]  ;;  %v207_v18 = vld [vmem:[%s1310_s27 + $0x38] sm:$0xff]  ;;  %v208_v20 = vld [vmem:[%s1310_s27 + $0x40] sm:$0xff] }
  0x14   : > { %1019 = vmatpush3.msra.mxu0 %v232_v3  ;;  %1075 = vmatpush3.msra.mxu1 %v232_v3  ;;  %v222_v17 = vld [vmem:[%s1310_s27 + $0xb0] sm:$0xff]  ;;  %v223_v19 = vld [vmem:[%s1310_s27 + $0xb8] sm:$0xff]  ;;  %v224_v21 = vld [vmem:[%s1310_s27 + $0xc0] sm:$0xff] }
  0x15   : > { %1020 = vmatprep.mubr.msk.f32.mxu0 %vm243_vm1, %v200_v4  ;;  %1044 = vmatprep.mubr.msk.f32.mxu1 %vm243_vm1, %v216_v5  ;;  %v209_v22 = vld [vmem:[%s1310_s27 + $0x48] sm:$0xff]  ;;  %v210_v24 = vld [vmem:[%s1310_s27 + $0x50] sm:$0xff]  ;;  %v211_v26 = vld [vmem:[%s1310_s27 + $0x58] sm:$0xff] }
  0x16   : > { %1021 = vmatmul.mubr.msk.f32.vlgmr.msra.gmra.mxu0 %vm243_vm1, %v201_v6  ;;  %1045 = vmatmul.mubr.msk.f32.vlgmr.msra.gmra.mxu1 %vm243_vm1, %v217_v7  ;;  %v225_v23 = vld [vmem:[%s1310_s27 + $0xc8] sm:$0xff]  ;;  %v226_v25 = vld [vmem:[%s1310_s27 + $0xd0] sm:$0xff]  ;;  %v227_v27 = vld [vmem:[%s1310_s27 + $0xd8] sm:$0xff] }
  0x17   : > { %1023 = vmatprep.mubr.msk.f32.mxu0 %vm243_vm1, %v202_v8  ;;  %1047 = vmatprep.mubr.msk.f32.mxu1 %vm243_vm1, %v218_v9  ;;  %v212_v28 = vld [vmem:[%s1310_s27 + $0x60] sm:$0xff]  ;;  %v213_v30 = vld [vmem:[%s1310_s27 + $0x68] sm:$0xff]  ;;  %v214_v32 = vld [vmem:[%s1310_s27 + $0x70] sm:$0xff] }
  0x18   : > { %v228_v29 = vld [vmem:[%s1310_s27 + $0xe0] sm:$0xff]  ;;  %v229_v31 = vld [vmem:[%s1310_s27 + $0xe8] sm:$0xff]  ;;  %v230_v33 = vld [vmem:[%s1310_s27 + $0xf0] sm:$0xff] }
  0x19   : > { %v215_v34 = vld [vmem:[%s1310_s27 + $0x78] sm:$0xff] }
  0x1a   : > { %1024 = vmatmul.mubr.msk.f32.gmra.mxu0 %vm243_vm1, %v203_v10  ;;  %1048 = vmatmul.mubr.msk.f32.gmra.mxu1 %vm243_vm1, %v219_v11  ;;  %v231_v35 = vld [vmem:[%s1310_s27 + $0xf8] sm:$0xff] }
  0x1b   : > { %1026 = vmatprep.mubr.msk.f32.mxu0 %vm243_vm1, %v204_v12  ;;  %1050 = vmatprep.mubr.msk.f32.mxu1 %vm243_vm1, %v220_v13 }
  0x1e   : > { %1027 = vmatmul.mubr.msk.f32.gmra.mxu0 %vm243_vm1, %v205_v14  ;;  %1051 = vmatmul.mubr.msk.f32.gmra.mxu1 %vm243_vm1, %v221_v15 }
  0x1f   : > { %1029 = vmatprep.mubr.msk.f32.mxu0 %vm243_vm1, %v206_v16  ;;  %1053 = vmatprep.mubr.msk.f32.mxu1 %vm243_vm1, %v222_v17 }
  0x22   : > { %1030 = vmatmul.mubr.msk.f32.gmra.mxu0 %vm243_vm1, %v207_v18  ;;  %1054 = vmatmul.mubr.msk.f32.gmra.mxu1 %vm243_vm1, %v223_v19 }
  0x23   : > { %1032 = vmatprep.mubr.msk.f32.mxu0 %vm243_vm1, %v208_v20  ;;  %1056 = vmatprep.mubr.msk.f32.mxu1 %vm243_vm1, %v224_v21 }
  0x26   : > { %1033 = vmatmul.mubr.msk.f32.gmra.mxu0 %vm243_vm1, %v209_v22  ;;  %1057 = vmatmul.mubr.msk.f32.gmra.mxu1 %vm243_vm1, %v225_v23 }
  0x27   : > { %1035 = vmatprep.mubr.msk.f32.mxu0 %vm243_vm1, %v210_v24  ;;  %1059 = vmatprep.mubr.msk.f32.mxu1 %vm243_vm1, %v226_v25 }
  0x2a   : > { %1036 = vmatmul.mubr.msk.f32.gmra.mxu0 %vm243_vm1, %v211_v26  ;;  %1060 = vmatmul.mubr.msk.f32.gmra.mxu1 %vm243_vm1, %v227_v27 }
  0x2b   : > { %1038 = vmatprep.mubr.msk.f32.mxu0 %vm243_vm1, %v212_v28  ;;  %1062 = vmatprep.mubr.msk.f32.mxu1 %vm243_vm1, %v228_v29 }
  0x2e   : > { %1039 = vmatmul.mubr.msk.f32.gmra.mxu0 %vm243_vm1, %v213_v30  ;;  %1063 = vmatmul.mubr.msk.f32.gmra.mxu1 %vm243_vm1, %v229_v31 }
  0x2f   : > { %1041 = vmatprep.mubr.msk.f32.mxu0 %vm243_vm1, %v214_v32  ;;  %1065 = vmatprep.mubr.msk.f32.mxu1 %vm243_vm1, %v230_v33 }
  0x32   : > { %1042 = vmatmul.mubr.msk.f32.gmra.mxu0 %vm243_vm1, %v215_v34  ;;  %1066 = vmatmul.mubr.msk.f32.gmra.mxu1 %vm243_vm1, %v231_v35 }
  0xd6   : > { %v1022_v38 = vpop.f32.mrf.mxu0  ;;  %v1046_v46 = vpop.f32.mrf.mxu1 }
  0xd7   : > { %v1389_v39 = vadd.f32 %v1022_v38, %v1386_v37  ;;  %v1447_v30 = vadd.f32 %v1046_v46, %v1386_v37 }
  0xd8   : > { %v410_v40 = vpop.f32.mrf.mxu0  ;;  %v490_v52 = vpop.f32.mrf.mxu1 }
  0xd9   : > { %v942_v41 = vmul.f32 -1.442695, %v1389_v39  ;;  %v1393_v42 = vadd.f32 %v1386_v37, %v410_v40  ;;  %v1454_v36 = vadd.f32 %v1386_v37, %v490_v52 }
  0xda   : > { %v1025_v43 = vpop.f32.mrf.mxu0  ;;  %v1411_v58 = vpop.f32.mrf.mxu1 }
  0xdb   : > { %v941_v44 = vmul.f32 -1.442695, %v1393_v42  ;;  %v1397_v45 = vadd.f32 %v1025_v43, %v1386_v37  ;;  %1101 = vpow2.f32 %v942_v41 }
  0xdc   : > { %v420_v47 = vpop.f32.mrf.mxu0  ;;  %v1417_v63 = vpop.f32.mrf.mxu1 }
  0xdd   : > { %1103 = vpow2.f32 %v941_v44  ;;  %v1400_v48 = vadd.f32 %v1386_v37, %v420_v47  ;;  %v944_v50 = vmul.f32 -1.442695, %v1397_v45  ;;  %v958_v47 = vmul.f32 -1.442695, %v1447_v30 }
  0xde   : > { %v1028_v49 = vpop.f32.mrf.mxu0  ;;  %v1423_v8 = vpop.f32.mrf.mxu1 }
  0xdf   : > { %v943_v51 = vmul.f32 -1.442695, %v1400_v48  ;;  %v1408_v55 = vadd.f32 %v1028_v49, %v1386_v37 }
  0xe0   : > { %v430_v53 = vpop.f32.mrf.mxu0  ;;  %v1426_v14 = vpop.f32.mrf.mxu1 }
  0xe1   : > { %1105 = vpow2.f32 %v943_v51  ;;  %v1405_v54 = vadd.f32 %v1386_v37, %v430_v53  ;;  %v946_v61 = vmul.f32 -1.442695, %v1408_v55 }
  0xe2   : > { %v1031_v56 = vpop.f32.mrf.mxu0  ;;  %1107 = vpow2.f32 %v944_v50  ;;  %v1431_v19 = vpop.f32.mrf.mxu1 }
  0xe3   : > { %v945_v57 = vmul.f32 -1.442695, %v1405_v54  ;;  %v1421_v4 = vadd.f32 %v1031_v56, %v1386_v37  ;;  %v957_v56 = vmul.f32 -1.442695, %v1454_v36 }
  0xe4   : > { %v440_v59 = vpop.f32.mrf.mxu0  ;;  %v1440_v26 = vpop.f32.mrf.mxu1 }
  0xe5   : > { %1109 = vpow2.f32 %v945_v57  ;;  %v1414_v60 = vadd.f32 %v1386_v37, %v440_v59  ;;  %v948_v10 = vmul.f32 -1.442695, %v1421_v4  ;;  %v1471_v57 = vadd.f32 %v1411_v58, %v1386_v37 }
  0xe6   : > { %v1034_v62 = vpop.f32.mrf.mxu0  ;;  %1111 = vpow2.f32 %v946_v61  ;;  %v1456_v40 = vpop.f32.mrf.mxu1 }
  0xe7   : > { %v947_v0 = vmul.f32 -1.442695, %v1414_v60  ;;  %v1429_v18 = vadd.f32 %v1034_v62, %v1386_v37 }
  0xe8   : > { %v450_v1 = vpop.f32.mrf.mxu0  ;;  %v1102_v2 = vpop.eup %1101 }
  0xe9   : > { %v666_v7 = vadd.f32 1.0, %v1102_v2  ;;  %1113 = vpow2.f32 %v947_v0  ;;  %v1434_v21 = vadd.f32 %v1386_v37, %v450_v1  ;;  %v950_v24 = vmul.f32 -1.442695, %v1429_v18  ;;  %v530_v59 = vpop.f32.mrf.mxu1 }
  0xea   : > { %v1104_v3 = vpop.eup %1103  ;;  %v1037_v5 = vpop.f32.mrf.mxu0  ;;  %v1481_v1 = vadd.f32 %v1386_v37, %v1417_v63 }
  0xeb   : > { %v665_v6 = vadd.f32 1.0, %v1104_v3  ;;  %v1438_v25 = vadd.f32 %v1037_v5, %v1386_v37  ;;  %v949_v28 = vmul.f32 -1.442695, %v1434_v21  ;;  %v1485_v3 = vadd.f32 %v1423_v8, %v1386_v37 }
  0xec   : > { %v460_v11 = vpop.f32.mrf.mxu0  ;;  %v1495_v8 = vadd.f32 %v1386_v37, %v1426_v14  ;;  %v1503_v14 = vadd.f32 %v1431_v19, %v1386_v37  ;;  %v1512_v19 = vadd.f32 %v1456_v40, %v1386_v37 }
  0xed   : > { %1115 = vrcp.f32 %v665_v6  ;;  %v1444_v29 = vadd.f32 %v1386_v37, %v460_v11  ;;  %v952_v33 = vmul.f32 -1.442695, %v1438_v25  ;;  %v1489_v6 = vpop.f32.mrf.mxu1 }
  0xee   : > { %v1106_v9 = vpop.eup %1105  ;;  %1117 = vrcp.f32 %v666_v7  ;;  %v1040_v16 = vpop.f32.mrf.mxu0 }
  0xef   : > { %v667_v12 = vadd.f32 1.0, %v1106_v9  ;;  %v1108_v13 = vpop.eup %1107  ;;  %v1451_v34 = vadd.f32 %v1040_v16, %v1386_v37  ;;  %v951_v44 = vmul.f32 -1.442695, %v1444_v29 }
  0xf0   : > { %v668_v17 = vadd.f32 1.0, %v1108_v13  ;;  %v470_v22 = vpop.f32.mrf.mxu0 }
  0xf1   : > { %1119 = vrcp.f32 %v667_v12  ;;  %v1459_v41 = vadd.f32 %v1386_v37, %v470_v22  ;;  %v954_v52 = vmul.f32 -1.442695, %v1451_v34  ;;  %v962_v12 = vmul.f32 -1.442695, %v1485_v3 }
  0xf2   : > { %v1110_v15 = vpop.eup %1109  ;;  %1121 = vpow2.f32 %v948_v10  ;;  %v1043_v32 = vpop.f32.mrf.mxu0  ;;  %v959_v10 = vmul.f32 -1.442695, %v1481_v1 }
  0xf3   : > { %v669_v20 = vadd.f32 1.0, %v1110_v15  ;;  %v1112_v23 = vpop.eup %1111  ;;  %1123 = vrcp.f32 %v668_v17  ;;  %v1466_v53 = vadd.f32 %v1043_v32, %v1386_v37  ;;  %v953_v61 = vmul.f32 -1.442695, %v1459_v41  ;;  %v540_v15 = vpop.f32.mrf.mxu1 }
  0xf4   : > { %v670_v31 = vadd.f32 1.0, %v1112_v23  ;;  %v480_v49 = vpop.f32.mrf.mxu0  ;;  %v961_v23 = vmul.f32 -1.442695, %v1495_v8 }
  0xf5   : > { %1125 = vrcp.f32 %v669_v20  ;;  %v1477_v0 = vadd.f32 %v1386_v37, %v480_v49 }
  0xf6   : > { %v1114_v27 = vpop.eup %1113  ;;  %1127 = vpow2.f32 %v950_v24  ;;  %v1507_v24 = vadd.f32 %v1386_v37, %v1440_v26 }
  0xf7   : > { %v671_v38 = vadd.f32 1.0, %v1114_v27  ;;  %1129 = vpow2.f32 %v949_v28  ;;  %v955_v63 = vmul.f32 -1.442695, %v1477_v0 }
  0xf8   : > { %1131 = vrcp.f32 %v670_v31 }
  0xf9   : > { %1133 = vpow2.f32 %v952_v33 }
  0xfa   : > { %v1116_v35 = vpop.eup %1115  ;;  %1135 = vrcp.f32 %v671_v38  ;;  %v964_v38 = vmul.f32 -1.442695, %v1503_v14 }
  0xfb   : > { %v1118_v43 = vpop.eup %1117  ;;  %v761_v51 = vmul.f32 %v1116_v35, %v1393_v42  ;;  %1137 = vpow2.f32 %v951_v44  ;;  %v963_v44 = vmul.f32 -1.442695, %v1507_v24 }
  0xfc   : > { %v762_v62 = vmul.f32 %v1118_v43, %v1389_v39  ;;  %1139 = vpow2.f32 %v958_v47  ;;  %v956_v39 = vmul.f32 -1.442695, %v1466_v53 }
  0xfd   : > { %1141 = vpow2.f32 %v954_v52 }
  0xfe   : > { %v1120_v46 = vpop.eup %1119  ;;  %v794_v58 = vadd.f32 %v762_v62, %v761_v51  ;;  %1143 = vpow2.f32 %v957_v56  ;;  %v966_v62 = vmul.f32 -1.442695, %v1512_v19 }
  0xff   : > { %v1122_v50 = vpop.eup %1121  ;;  %v763_v42 = vmul.f32 %v1120_v46, %v1400_v48  ;;  %v960_v48 = vmul.f32 -1.442695, %v1471_v57  ;;  %1145 = vpow2.f32 %v953_v61  ;;  %v1517_v46 = vadd.f32 %v1386_v37, %v530_v59 }
 0x100   : > { %v672_v2 = vadd.f32 1.0, %v1122_v50  ;;  %v1124_v5 = vpop.eup %1123 }
 0x101   : > { %v795_v7 = vadd.f32 %v794_v58, %v763_v42  ;;  %v764_v11 = vmul.f32 %v1124_v5, %v1397_v45  ;;  %v965_v59 = vmul.f32 -1.442695, %v1517_v46 }
 0x102   : > { %v1126_v9 = vpop.eup %1125  ;;  %1147 = vrcp.f32 %v672_v2 }
 0x103   : > { %1149 = vpow2.f32 %v956_v39  ;;  %v1128_v13 = vpop.eup %1127  ;;  %v765_v16 = vmul.f32 %v1126_v9, %v1405_v54  ;;  %v796_v17 = vadd.f32 %v795_v7, %v764_v11  ;;  %v1064_v54 = vpop.f32.mrf.mxu1 }
 0x104   : > { %1151 = vpow2.f32 %v960_v48  ;;  %v674_v20 = vadd.f32 1.0, %v1128_v13  ;;  %v1130_v22 = vpop.eup %1129  ;;  %v1527_v48 = vadd.f32 %v1489_v6, %v1386_v37  ;;  %v1535_v6 = vadd.f32 %v1064_v54, %v1386_v37 }
 0x105   : > { %1153 = vpow2.f32 %v955_v63  ;;  %v1132_v45 = vpop.eup %1131  ;;  %v673_v27 = vadd.f32 1.0, %v1130_v22  ;;  %v797_v32 = vadd.f32 %v796_v17, %v765_v16  ;;  %v550_v50 = vpop.f32.mrf.mxu1 }
 0x106   : > { %1155 = vpow2.f32 %v959_v10  ;;  %v1134_v28 = vpop.eup %1133  ;;  %v766_v26 = vmul.f32 %v1132_v45, %v1408_v55  ;;  %v1522_v55 = vadd.f32 %v1386_v37, %v540_v15  ;;  %v1532_v13 = vadd.f32 %v1386_v37, %v550_v50 }
 0x107   : > { %1157 = vpow2.f32 %v962_v12  ;;  %v1136_v31 = vpop.eup %1135  ;;  %v676_v33 = vadd.f32 1.0, %v1134_v28  ;;  %v1067_v39 = vpop.f32.mrf.mxu1  ;;  %v968_v45 = vmul.f32 -1.442695, %v1527_v48 }
 0x108   : > { %1159 = vrcp.f32 %v674_v20  ;;  %v1138_v35 = vpop.eup %1137  ;;  %v767_v52 = vmul.f32 %v1136_v31, %v1414_v60  ;;  %v798_v56 = vadd.f32 %v797_v32, %v766_v26  ;;  %v967_v10 = vmul.f32 -1.442695, %v1522_v55 }
 0x109   : > { %1161 = vrcp.f32 %v673_v27  ;;  %v1140_v43 = vpop.eup %1139  ;;  %v675_v47 = vadd.f32 1.0, %v1138_v35  ;;  %v560_v20 = vpop.f32.mrf.mxu1  ;;  %v969_v32 = vmul.f32 -1.442695, %v1532_v13  ;;  %v970_v35 = vmul.f32 -1.442695, %v1535_v6 }
 0x10a   : > { %1163 = vpow2.f32 %v961_v23  ;;  %v1142_v49 = vpop.eup %1141  ;;  %v799_v60 = vadd.f32 %v798_v56, %v767_v52  ;;  %v682_v17 = vadd.f32 1.0, %v1140_v43 }
 0x10b   : > { %1165 = vrcp.f32 %v676_v33  ;;  %v1144_v51 = vpop.eup %1143  ;;  %v678_v61 = vadd.f32 1.0, %v1142_v49  ;;  %v1541_v33 = vadd.f32 %v1386_v37, %v560_v20 }
 0x10c   : > { %1167 = vrcp.f32 %v675_v47  ;;  %v1146_v40 = vpop.eup %1145  ;;  %v681_v9 = vadd.f32 1.0, %v1144_v51 }
 0x10d   : > { %1169 = vpow2.f32 %v964_v38  ;;  %v677_v2 = vadd.f32 1.0, %v1146_v40  ;;  %v971_v52 = vmul.f32 -1.442695, %v1541_v33 }
 0x10e   : > { %1171 = vpow2.f32 %v963_v44  ;;  %v1546_v44 = vadd.f32 %v1067_v39, %v1386_v37 }
 0x10f   : > { %v1148_v42 = vpop.eup %1147  ;;  %1173 = vrcp.f32 %v678_v61 }
 0x110   : > { %v1150_v58 = vpop.eup %1149  ;;  %1175 = vrcp.f32 %v677_v2  ;;  %v768_v12 = vmul.f32 %v1148_v42, %v1421_v4  ;;  %v972_v37 = vmul.f32 -1.442695, %v1546_v44 }
 0x111   : > { %v1152_v5 = vpop.eup %1151  ;;  %v680_v7 = vadd.f32 1.0, %v1150_v58  ;;  %1177 = vpow2.f32 %v966_v62 }
 0x112   : > { %v1154_v63 = vpop.eup %1153  ;;  %1179 = vpow2.f32 %v965_v59  ;;  %v800_v23 = vadd.f32 %v799_v60, %v768_v12  ;;  %v684_v54 = vadd.f32 1.0, %v1152_v5 }
 0x113   : > { %v1156_v11 = vpop.eup %1155  ;;  %v679_v15 = vadd.f32 1.0, %v1154_v63  ;;  %1181 = vrcp.f32 %v680_v7 }
 0x114   : > { %v1158_v16 = vpop.eup %1157  ;;  %v683_v4 = vadd.f32 1.0, %v1156_v11 }
 0x115   : > { %v1160_v22 = vpop.eup %1159  ;;  %1183 = vrcp.f32 %v679_v15  ;;  %v686_v61 = vadd.f32 1.0, %v1158_v16 }
 0x116   : > { %v1162_v27 = vpop.eup %1161  ;;  %1185 = vrcp.f32 %v681_v9  ;;  %v770_v43 = vmul.f32 %v1160_v22, %v1429_v18 }
 0x117   : > { %v1164_v28 = vpop.eup %1163  ;;  %v769_v31 = vmul.f32 %v1162_v27, %v1434_v21  ;;  %1187 = vpow2.f32 %v967_v10 }
 0x118   : > { %1189 = vrcp.f32 %v682_v17  ;;  %v1166_v38 = vpop.eup %1165  ;;  %v685_v21 = vadd.f32 1.0, %v1164_v28 }
 0x119   : > { %v801_v26 = vadd.f32 %v800_v23, %v769_v31  ;;  %1191 = vpow2.f32 %v968_v45  ;;  %v1168_v47 = vpop.eup %1167  ;;  %v772_v18 = vmul.f32 %v1166_v38, %v1438_v25 }
 0x11a   : > { %1193 = vrcp.f32 %v683_v4  ;;  %v1170_v49 = vpop.eup %1169  ;;  %v771_v50 = vmul.f32 %v1168_v47, %v1444_v29 }
 0x11b   : > { %v802_v51 = vadd.f32 %v801_v26, %v770_v43  ;;  %1195 = vpow2.f32 %v969_v32  ;;  %v1172_v56 = vpop.eup %1171  ;;  %v688_v60 = vadd.f32 1.0, %v1170_v49 }
 0x11c   : > { %1197 = vrcp.f32 %v684_v54  ;;  %v1174_v40 = vpop.eup %1173  ;;  %v687_v2 = vadd.f32 1.0, %v1172_v56 }
 0x11d   : > { %v803_v62 = vadd.f32 %v802_v51, %v771_v50  ;;  %1199 = vpow2.f32 %v970_v35  ;;  %v1176_v42 = vpop.eup %1175  ;;  %v774_v7 = vmul.f32 %v1174_v40, %v1451_v34 }
 0x11e   : > { %1201 = vrcp.f32 %v685_v21  ;;  %v1178_v59 = vpop.eup %1177  ;;  %v773_v29 = vmul.f32 %v1176_v42, %v1459_v41 }
 0x11f   : > { %v804_v58 = vadd.f32 %v803_v62, %v772_v18  ;;  %1203 = vpow2.f32 %v971_v52  ;;  %v1180_v39 = vpop.eup %1179  ;;  %v690_v41 = vadd.f32 1.0, %v1178_v59 }
 0x120   : > { %1205 = vrcp.f32 %v686_v61  ;;  %v1182_v5 = vpop.eup %1181  ;;  %v689_v10 = vadd.f32 1.0, %v1180_v39 }
 0x121   : > { %v805_v63 = vadd.f32 %v804_v58, %v773_v29  ;;  %1207 = vpow2.f32 %v972_v37  ;;  %v776_v17 = vmul.f32 %v1182_v5, %v1466_v53 }
 0x122   : > { %v1184_v25 = vpop.eup %1183  ;;  %1209 = vrcp.f32 %v687_v2 }
 0x123   : > { %v1186_v9 = vpop.eup %1185  ;;  %v775_v11 = vmul.f32 %v1184_v25, %v1477_v0  ;;  %v806_v12 = vadd.f32 %v805_v63, %v774_v7  ;;  %1211 = vrcp.f32 %v688_v60 }
 0x124   : > { %v1188_v15 = vpop.eup %1187  ;;  %v777_v34 = vmul.f32 %v1186_v9, %v1454_v36  ;;  %1213 = vrcp.f32 %v689_v10 }
 0x125   : > { %v1190_v16 = vpop.eup %1189  ;;  %v807_v20 = vadd.f32 %v806_v12, %v775_v11  ;;  %v691_v45 = vadd.f32 1.0, %v1188_v15  ;;  %1215 = vrcp.f32 %v690_v41 }
 0x126   : > { %v1192_v22 = vpop.eup %1191  ;;  %v778_v31 = vmul.f32 %v1190_v16, %v1447_v30 }
 0x127   : > { %v1194_v23 = vpop.eup %1193  ;;  %v808_v27 = vadd.f32 %v807_v20, %v776_v17  ;;  %v692_v0 = vadd.f32 1.0, %v1192_v22  ;;  %1217 = vrcp.f32 %v691_v45 }
 0x128   : > { %v1196_v4 = vpop.eup %1195  ;;  %v779_v38 = vmul.f32 %v1194_v23, %v1481_v1 }
 0x129   : > { %v1198_v28 = vpop.eup %1197  ;;  %v809_v32 = vadd.f32 %v808_v27, %v777_v34  ;;  %v693_v53 = vadd.f32 1.0, %v1196_v4  ;;  %1219 = vrcp.f32 %v692_v0  ;;  %v793_v34 = vld [vmem:[%s1380_s30] sm:$0x1] }
 0x12a   : > { %v1200_v54 = vpop.eup %1199  ;;  %v780_v36 = vmul.f32 %v1198_v28, %v1471_v57 }
 0x12b   : > { %v1202_v35 = vpop.eup %1201  ;;  %v810_v43 = vadd.f32 %v809_v32, %v778_v31  ;;  %v694_v21 = vadd.f32 1.0, %v1200_v54  ;;  %1221 = vrcp.f32 %v693_v53 }
 0x12c   : > { %v1204_v26 = vpop.eup %1203  ;;  %v781_v30 = vmul.f32 %v1202_v35, %v1495_v8 }
 0x12d   : > { %v1206_v47 = vpop.eup %1205  ;;  %v811_v49 = vadd.f32 %v810_v43, %v779_v38  ;;  %v695_v52 = vadd.f32 1.0, %v1204_v26  ;;  %1223 = vrcp.f32 %v694_v21 }
 0x12e   : > { %v1208_v50 = vpop.eup %1207  ;;  %v782_v61 = vmul.f32 %v1206_v47, %v1485_v3 }
 0x12f   : > { %v812_v51 = vadd.f32 %v811_v49, %v780_v36  ;;  %v1210_v56 = vpop.eup %1209  ;;  %v696_v1 = vadd.f32 1.0, %v1208_v50  ;;  %1225 = vrcp.f32 %v695_v52 }
 0x130   : > { %v1212_v18 = vpop.eup %1211  ;;  %v783_v62 = vmul.f32 %v1210_v56, %v1507_v24 }
 0x131   : > { %v813_v40 = vadd.f32 %v812_v51, %v781_v30  ;;  %v1214_v57 = vpop.eup %1213  ;;  %v784_v42 = vmul.f32 %v1212_v18, %v1503_v14  ;;  %1227 = vrcp.f32 %v696_v1 }
 0x132   : > { %v1216_v8 = vpop.eup %1215  ;;  %v785_v2 = vmul.f32 %v1214_v57, %v1517_v46 }
 0x133   : > { %v814_v37 = vadd.f32 %v813_v40, %v782_v61  ;;  %v786_v3 = vmul.f32 %v1216_v8, %v1512_v19 }
 0x134   : > { %v1218_v58 = vpop.eup %1217 }
 0x135   : > { %v815_v59 = vadd.f32 %v814_v37, %v783_v62  ;;  %v787_v60 = vmul.f32 %v1218_v58, %v1522_v55 }
 0x136   : > { %v1220_v5 = vpop.eup %1219 }
 0x137   : > { %v816_v29 = vadd.f32 %v815_v59, %v784_v42  ;;  %v788_v63 = vmul.f32 %v1220_v5, %v1527_v48 }
 0x138   : > { %v1222_v24 = vpop.eup %1221 }
 0x139   : > { %v817_v39 = vadd.f32 %v816_v29, %v785_v2  ;;  %v789_v14 = vmul.f32 %v1222_v24, %v1532_v13 }
 0x13a   : > { %v1224_v9 = vpop.eup %1223 }
 0x13b   : > { %v818_v7 = vadd.f32 %v817_v39, %v786_v3  ;;  %v790_v46 = vmul.f32 %v1224_v9, %v1535_v6 }
 0x13c   : > { %v1226_v11 = vpop.eup %1225 }
 0x13d   : > { %v819_v25 = vadd.f32 %v818_v7, %v787_v60  ;;  %v791_v15 = vmul.f32 %v1226_v11, %v1541_v33 }
 0x13e   : > { %v1228_v19 = vpop.eup %1227 }
 0x13f   : > { %v820_v10 = vadd.f32 %v819_v25, %v788_v63  ;;  %v792_v16 = vmul.f32 %v1228_v19, %v1546_v44 }
 0x141   : > { %v821_v12 = vadd.f32 %v820_v10, %v789_v14 }
 0x143   : > { %v822_v55 = vadd.f32 %v821_v12, %v790_v46 }
 0x145   : > { %v823_v48 = vadd.f32 %v822_v55, %v791_v15 }
 0x147   : > { %v824_v41 = vadd.f32 %v823_v48, %v792_v16 }
 0x149   : > { %v825_v17 = vrot.slane %v824_v41, 4 }
 0x14b   : > { %v826_v20 = vadd.f32 %v825_v17, %v824_v41 }
 0x14d   : > { %v827_v13 = vrot.slane %v826_v20, 2 }
 0x14f   : > { %v828_v22 = vadd.f32 %v827_v13, %v826_v20 }
 0x151   : > { %v829_v23 = vrot.slane %v828_v22, 1 }
 0x153   : > { %v830_v45 = vadd.f32 %v829_v23, %v828_v22 }
 0x155   : > { %v831_v6 = vadd.f32 %v830_v45, %v793_v34 }
 0x157   : > { %832 = vst [vmem:[%s1380_s30] sm:$0x1] %v831_v6 }
 0x15e   : > { %v836_v27 = vld [vmem:[%s1380_s30] sm:$0x1] }
 0x15f   : > { %v837_v4 = vmul.f32 0.00390625, %v836_v27 }
 0x161   : > { %838 = vst [vmem:[%s1380_s30] sm:$0x1] %v837_v4 }
 0x162 PF: > { %s13_s14 = sadd.s32 1, %s1251_s14   ;;  %s1589_s12 = smov %s1247_s13 }
 0x163   : > { %p10_p5 = scmp.ge.s32.totalorder %s13_s14, 4   ;;  %s1590_s13 = smov %s1592_s15 }
 0x165   :  { %12 = sbr.rel (!%p10_p5) target bundleno = 2 (0x2), region = 70 }

// kernel: _lambda_.3
= control target key start
LH: loop header
LB: loop body
LE: loop exit
PB: predicated region body
PF: predicated region fallthrough
CT: control target
= control target key end

     0   :  { %v1037_v3 = vmov 0.0   ;;  %s1878_s1 = inlined_call_operand.vmem [shape: f32[128,1024], index: 1, kind: input, shape index: {}]   ;;  %s1879_s0 = inlined_call_operand.vmem [shape: f32[2,128], index: 0, kind: input, shape index: {}]   ;;  %s1880_s3 = inlined_call_operand.vmem [shape: f32[1024,128], index: 3, kind: input, shape index: {}]   ;;  %s1881_s2 = inlined_call_operand.vmem [shape: f32[1,1024], index: 2, kind: input, shape index: {}]   ;;  %s1882_s4 = inlined_call_operand.vmem [shape: f32[1,128], index: 4, kind: input, shape index: {}]   ;;  %s1883_s5 = inlined_call_operand.vmem [shape: f32[2,128], index: 5, kind: output, shape index: {}]  }
   0x1   :  { %v142_v0 = vld [vmem:[%s1878_s1 + $0x3c8] sm:$0xff]  ;;  %v144_v1 = vld [vmem:[%s1878_s1 + $0x3d8] sm:$0xff]  ;;  %v141_v2 = vld [vmem:[%s1878_s1 + $0x3c0] sm:$0xff]  ;;  %255 = vmatprep.mubr.f32.mxu0 %v1037_v3  ;;  %326 = vmatprep.mubr.f32.mxu1 %v1037_v3 }
   0x2   :  { %191 = vmatprep.subr.mxu0 %v142_v0  ;;  %262 = vmatprep.subr.mxu1 %v144_v1  ;;  %v143_v4 = vld [vmem:[%s1878_s1 + $0x3d0] sm:$0xff]  ;;  %v134_v5 = vld [vmem:[%s1878_s1 + $0x388] sm:$0xff]  ;;  %v136_v6 = vld [vmem:[%s1878_s1 + $0x398] sm:$0xff] }
   0x3   :  { %192 = vmatpush1.msra.mxu0 %v141_v2  ;;  %263 = vmatpush1.msra.mxu1 %v143_v4  ;;  %v133_v7 = vld [vmem:[%s1878_s1 + $0x380] sm:$0xff]  ;;  %v135_v8 = vld [vmem:[%s1878_s1 + $0x390] sm:$0xff]  ;;  %v126_v9 = vld [vmem:[%s1878_s1 + $0x348] sm:$0xff] }
   0x4   :  { %193 = vmatprep.subr.mxu0 %v134_v5  ;;  %264 = vmatprep.subr.mxu1 %v136_v6  ;;  %v128_v10 = vld [vmem:[%s1878_s1 + $0x358] sm:$0xff]  ;;  %v125_v11 = vld [vmem:[%s1878_s1 + $0x340] sm:$0xff]  ;;  %v127_v12 = vld [vmem:[%s1878_s1 + $0x350] sm:$0xff] }
   0x5   :  { %194 = vmatpush1.msra.mxu0 %v133_v7  ;;  %265 = vmatpush1.msra.mxu1 %v135_v8  ;;  %v118_v13 = vld [vmem:[%s1878_s1 + $0x308] sm:$0xff]  ;;  %v120_v14 = vld [vmem:[%s1878_s1 + $0x318] sm:$0xff]  ;;  %v117_v15 = vld [vmem:[%s1878_s1 + $0x300] sm:$0xff] }
   0x6   :  { %195 = vmatprep.subr.mxu0 %v126_v9  ;;  %266 = vmatprep.subr.mxu1 %v128_v10  ;;  %v119_v16 = vld [vmem:[%s1878_s1 + $0x310] sm:$0xff]  ;;  %v110_v17 = vld [vmem:[%s1878_s1 + $0x2c8] sm:$0xff]  ;;  %v112_v18 = vld [vmem:[%s1878_s1 + $0x2d8] sm:$0xff] }
   0x7   :  { %196 = vmatpush1.msra.mxu0 %v125_v11  ;;  %267 = vmatpush1.msra.mxu1 %v127_v12  ;;  %v109_v19 = vld [vmem:[%s1878_s1 + $0x2c0] sm:$0xff]  ;;  %v111_v20 = vld [vmem:[%s1878_s1 + $0x2d0] sm:$0xff]  ;;  %v102_v21 = vld [vmem:[%s1878_s1 + $0x288] sm:$0xff] }
   0x8   :  { %197 = vmatprep.subr.mxu0 %v118_v13  ;;  %268 = vmatprep.subr.mxu1 %v120_v14  ;;  %v104_v22 = vld [vmem:[%s1878_s1 + $0x298] sm:$0xff]  ;;  %v101_v23 = vld [vmem:[%s1878_s1 + $0x280] sm:$0xff]  ;;  %v103_v24 = vld [vmem:[%s1878_s1 + $0x290] sm:$0xff] }
   0x9   :  { %198 = vmatpush1.msra.mxu0 %v117_v15  ;;  %269 = vmatpush1.msra.mxu1 %v119_v16  ;;  %v94_v25 = vld [vmem:[%s1878_s1 + $0x248] sm:$0xff]  ;;  %v96_v26 = vld [vmem:[%s1878_s1 + $0x258] sm:$0xff]  ;;  %v93_v27 = vld [vmem:[%s1878_s1 + $0x240] sm:$0xff] }
   0xa   :  { %199 = vmatprep.subr.mxu0 %v110_v17  ;;  %270 = vmatprep.subr.mxu1 %v112_v18  ;;  %v95_v28 = vld [vmem:[%s1878_s1 + $0x250] sm:$0xff]  ;;  %v86_v29 = vld [vmem:[%s1878_s1 + $0x208] sm:$0xff]  ;;  %v88_v30 = vld [vmem:[%s1878_s1 + $0x218] sm:$0xff] }
   0xb   :  { %200 = vmatpush1.msra.mxu0 %v109_v19  ;;  %271 = vmatpush1.msra.mxu1 %v111_v20  ;;  %v85_v31 = vld [vmem:[%s1878_s1 + $0x200] sm:$0xff]  ;;  %v87_v32 = vld [vmem:[%s1878_s1 + $0x210] sm:$0xff]  ;;  %v78_v33 = vld [vmem:[%s1878_s1 + $0x1c8] sm:$0xff] }
   0xc   :  { %201 = vmatprep.subr.mxu0 %v102_v21  ;;  %272 = vmatprep.subr.mxu1 %v104_v22  ;;  %v80_v34 = vld [vmem:[%s1878_s1 + $0x1d8] sm:$0xff]  ;;  %v77_v35 = vld [vmem:[%s1878_s1 + $0x1c0] sm:$0xff]  ;;  %v79_v36 = vld [vmem:[%s1878_s1 + $0x1d0] sm:$0xff] }
   0xd   :  { %202 = vmatpush1.msra.mxu0 %v101_v23  ;;  %273 = vmatpush1.msra.mxu1 %v103_v24  ;;  %v70_v37 = vld [vmem:[%s1878_s1 + $0x188] sm:$0xff]  ;;  %v72_v38 = vld [vmem:[%s1878_s1 + $0x198] sm:$0xff]  ;;  %v69_v39 = vld [vmem:[%s1878_s1 + $0x180] sm:$0xff] }
   0xe   :  { %203 = vmatprep.subr.mxu0 %v94_v25  ;;  %274 = vmatprep.subr.mxu1 %v96_v26  ;;  %v71_v40 = vld [vmem:[%s1878_s1 + $0x190] sm:$0xff]  ;;  %v62_v41 = vld [vmem:[%s1878_s1 + $0x148] sm:$0xff]  ;;  %v64_v42 = vld [vmem:[%s1878_s1 + $0x158] sm:$0xff] }
   0xf   :  { %204 = vmatpush1.msra.mxu0 %v93_v27  ;;  %275 = vmatpush1.msra.mxu1 %v95_v28  ;;  %v61_v43 = vld [vmem:[%s1878_s1 + $0x140] sm:$0xff]  ;;  %v63_v44 = vld [vmem:[%s1878_s1 + $0x150] sm:$0xff]  ;;  %v54_v45 = vld [vmem:[%s1878_s1 + $0x108] sm:$0xff] }
  0x10   :  { %205 = vmatprep.subr.mxu0 %v86_v29  ;;  %276 = vmatprep.subr.mxu1 %v88_v30  ;;  %v56_v46 = vld [vmem:[%s1878_s1 + $0x118] sm:$0xff]  ;;  %v53_v47 = vld [vmem:[%s1878_s1 + $0x100] sm:$0xff]  ;;  %v55_v48 = vld [vmem:[%s1878_s1 + $0x110] sm:$0xff] }
  0x11   :  { %206 = vmatpush1.msra.mxu0 %v85_v31  ;;  %277 = vmatpush1.msra.mxu1 %v87_v32  ;;  %v46_v49 = vld [vmem:[%s1878_s1 + $0xc8] sm:$0xff]  ;;  %v48_v50 = vld [vmem:[%s1878_s1 + $0xd8] sm:$0xff]  ;;  %v45_v51 = vld [vmem:[%s1878_s1 + $0xc0] sm:$0xff] }
  0x12   :  { %207 = vmatprep.subr.mxu0 %v78_v33  ;;  %278 = vmatprep.subr.mxu1 %v80_v34  ;;  %v47_v52 = vld [vmem:[%s1878_s1 + $0xd0] sm:$0xff]  ;;  %v38_v53 = vld [vmem:[%s1878_s1 + $0x88] sm:$0xff]  ;;  %v40_v54 = vld [vmem:[%s1878_s1 + $0x98] sm:$0xff] }
  0x13   :  { %208 = vmatpush1.msra.mxu0 %v77_v35  ;;  %279 = vmatpush1.msra.mxu1 %v79_v36  ;;  %v37_v55 = vld [vmem:[%s1878_s1 + $0x80] sm:$0xff]  ;;  %v39_v56 = vld [vmem:[%s1878_s1 + $0x90] sm:$0xff]  ;;  %v30_v57 = vld [vmem:[%s1878_s1 + $0x48] sm:$0xff] }
  0x14   :  { %209 = vmatprep.subr.mxu0 %v70_v37  ;;  %280 = vmatprep.subr.mxu1 %v72_v38  ;;  %v32_v58 = vld [vmem:[%s1878_s1 + $0x58] sm:$0xff]  ;;  %v29_v59 = vld [vmem:[%s1878_s1 + $0x40] sm:$0xff]  ;;  %v31_v60 = vld [vmem:[%s1878_s1 + $0x50] sm:$0xff] }
  0x15   :  { %210 = vmatpush1.msra.mxu0 %v69_v39  ;;  %281 = vmatpush1.msra.mxu1 %v71_v40  ;;  %v22_v61 = vld [vmem:[%s1878_s1 + $0x8] sm:$0xff]  ;;  %v24_v62 = vld [vmem:[%s1878_s1 + $0x18] sm:$0xff]  ;;  %v21_v63 = vld [vmem:[%s1878_s1] sm:$0xff] }
  0x16   :  { %211 = vmatprep.subr.mxu0 %v62_v41  ;;  %282 = vmatprep.subr.mxu1 %v64_v42  ;;  %v23_v0 = vld [vmem:[%s1878_s1 + $0x10] sm:$0xff]  ;;  %v1265_v1 = vld [vmem:[%s1879_s0] sm:$0x3]  ;;  %v146_v2 = vld [vmem:[%s1878_s1 + $0x3e8] sm:$0xff] }
  0x17   :  { %212 = vmatpush1.msra.mxu0 %v61_v43  ;;  %283 = vmatpush1.msra.mxu1 %v63_v44  ;;  %v148_v4 = vld [vmem:[%s1878_s1 + $0x3f8] sm:$0xff]  ;;  %v145_v5 = vld [vmem:[%s1878_s1 + $0x3e0] sm:$0xff]  ;;  %v147_v6 = vld [vmem:[%s1878_s1 + $0x3f0] sm:$0xff] }
  0x18   :  { %213 = vmatprep.subr.mxu0 %v54_v45  ;;  %284 = vmatprep.subr.mxu1 %v56_v46  ;;  %v138_v7 = vld [vmem:[%s1878_s1 + $0x3a8] sm:$0xff]  ;;  %v140_v8 = vld [vmem:[%s1878_s1 + $0x3b8] sm:$0xff]  ;;  %v137_v9 = vld [vmem:[%s1878_s1 + $0x3a0] sm:$0xff] }
  0x19   :  { %214 = vmatpush1.msra.mxu0 %v53_v47  ;;  %285 = vmatpush1.msra.mxu1 %v55_v48  ;;  %v139_v10 = vld [vmem:[%s1878_s1 + $0x3b0] sm:$0xff]  ;;  %v130_v11 = vld [vmem:[%s1878_s1 + $0x368] sm:$0xff]  ;;  %v132_v12 = vld [vmem:[%s1878_s1 + $0x378] sm:$0xff] }
  0x1a   :  { %215 = vmatprep.subr.mxu0 %v46_v49  ;;  %286 = vmatprep.subr.mxu1 %v48_v50  ;;  %v129_v13 = vld [vmem:[%s1878_s1 + $0x360] sm:$0xff]  ;;  %v131_v14 = vld [vmem:[%s1878_s1 + $0x370] sm:$0xff]  ;;  %v122_v15 = vld [vmem:[%s1878_s1 + $0x328] sm:$0xff] }
  0x1b   :  { %216 = vmatpush1.msra.mxu0 %v45_v51  ;;  %287 = vmatpush1.msra.mxu1 %v47_v52  ;;  %v124_v16 = vld [vmem:[%s1878_s1 + $0x338] sm:$0xff]  ;;  %v121_v17 = vld [vmem:[%s1878_s1 + $0x320] sm:$0xff]  ;;  %v123_v18 = vld [vmem:[%s1878_s1 + $0x330] sm:$0xff] }
  0x1c   :  { %217 = vmatprep.subr.mxu0 %v38_v53  ;;  %288 = vmatprep.subr.mxu1 %v40_v54  ;;  %v114_v19 = vld [vmem:[%s1878_s1 + $0x2e8] sm:$0xff]  ;;  %v116_v20 = vld [vmem:[%s1878_s1 + $0x2f8] sm:$0xff]  ;;  %v113_v21 = vld [vmem:[%s1878_s1 + $0x2e0] sm:$0xff] }
  0x1d   :  { %218 = vmatpush1.msra.mxu0 %v37_v55  ;;  %289 = vmatpush1.msra.mxu1 %v39_v56  ;;  %v115_v22 = vld [vmem:[%s1878_s1 + $0x2f0] sm:$0xff]  ;;  %v106_v23 = vld [vmem:[%s1878_s1 + $0x2a8] sm:$0xff]  ;;  %v108_v24 = vld [vmem:[%s1878_s1 + $0x2b8] sm:$0xff] }
  0x1e   :  { %219 = vmatprep.subr.mxu0 %v30_v57  ;;  %290 = vmatprep.subr.mxu1 %v32_v58  ;;  %v105_v25 = vld [vmem:[%s1878_s1 + $0x2a0] sm:$0xff]  ;;  %v107_v26 = vld [vmem:[%s1878_s1 + $0x2b0] sm:$0xff]  ;;  %v98_v27 = vld [vmem:[%s1878_s1 + $0x268] sm:$0xff] }
  0x1f   :  { %220 = vmatpush1.msra.mxu0 %v29_v59  ;;  %291 = vmatpush1.msra.mxu1 %v31_v60  ;;  %v100_v28 = vld [vmem:[%s1878_s1 + $0x278] sm:$0xff]  ;;  %v97_v29 = vld [vmem:[%s1878_s1 + $0x260] sm:$0xff]  ;;  %v99_v30 = vld [vmem:[%s1878_s1 + $0x270] sm:$0xff] }
  0x20   :  { %221 = vmatprep.subr.mxu0 %v22_v61  ;;  %292 = vmatprep.subr.mxu1 %v24_v62  ;;  %v90_v31 = vld [vmem:[%s1878_s1 + $0x228] sm:$0xff]  ;;  %v92_v32 = vld [vmem:[%s1878_s1 + $0x238] sm:$0xff]  ;;  %v89_v33 = vld [vmem:[%s1878_s1 + $0x220] sm:$0xff] }
  0x21   :  { %222 = vmatpush1.msra.mxu0 %v21_v63  ;;  %293 = vmatpush1.msra.mxu1 %v23_v0  ;;  %v91_v34 = vld [vmem:[%s1878_s1 + $0x230] sm:$0xff]  ;;  %v82_v35 = vld [vmem:[%s1878_s1 + $0x1e8] sm:$0xff]  ;;  %v84_v36 = vld [vmem:[%s1878_s1 + $0x1f8] sm:$0xff] }
  0x22   :  { %256 = vmatmul.mubr.f32.vlgmr.msra.gmra.mxu0 %v1265_v1  ;;  %327 = vmatmul.mubr.f32.vlgmr.msra.gmra.mxu1 %v1265_v1  ;;  %v81_v37 = vld [vmem:[%s1878_s1 + $0x1e0] sm:$0xff]  ;;  %v83_v38 = vld [vmem:[%s1878_s1 + $0x1f0] sm:$0xff]  ;;  %v74_v39 = vld [vmem:[%s1878_s1 + $0x1a8] sm:$0xff] }
  0x23   :  { %333 = vmatprep.subr.mxu0 %v146_v2  ;;  %404 = vmatprep.subr.mxu1 %v148_v4  ;;  %v76_v40 = vld [vmem:[%s1878_s1 + $0x1b8] sm:$0xff]  ;;  %v73_v41 = vld [vmem:[%s1878_s1 + $0x1a0] sm:$0xff]  ;;  %v75_v42 = vld [vmem:[%s1878_s1 + $0x1b0] sm:$0xff] }
  0x24   :  { %334 = vmatpush1.msra.mxu0 %v145_v5  ;;  %405 = vmatpush1.msra.mxu1 %v147_v6  ;;  %v66_v43 = vld [vmem:[%s1878_s1 + $0x168] sm:$0xff]  ;;  %v68_v44 = vld [vmem:[%s1878_s1 + $0x178] sm:$0xff]  ;;  %v65_v45 = vld [vmem:[%s1878_s1 + $0x160] sm:$0xff] }
  0x25   :  { %335 = vmatprep.subr.mxu0 %v138_v7  ;;  %406 = vmatprep.subr.mxu1 %v140_v8  ;;  %v67_v46 = vld [vmem:[%s1878_s1 + $0x170] sm:$0xff]  ;;  %v58_v47 = vld [vmem:[%s1878_s1 + $0x128] sm:$0xff]  ;;  %v60_v48 = vld [vmem:[%s1878_s1 + $0x138] sm:$0xff] }
  0x26   :  { %336 = vmatpush1.msra.mxu0 %v137_v9  ;;  %407 = vmatpush1.msra.mxu1 %v139_v10  ;;  %v57_v49 = vld [vmem:[%s1878_s1 + $0x120] sm:$0xff]  ;;  %v59_v50 = vld [vmem:[%s1878_s1 + $0x130] sm:$0xff]  ;;  %v50_v51 = vld [vmem:[%s1878_s1 + $0xe8] sm:$0xff] }
  0x27   :  { %337 = vmatprep.subr.mxu0 %v130_v11  ;;  %408 = vmatprep.subr.mxu1 %v132_v12  ;;  %v52_v52 = vld [vmem:[%s1878_s1 + $0xf8] sm:$0xff]  ;;  %v49_v53 = vld [vmem:[%s1878_s1 + $0xe0] sm:$0xff]  ;;  %v51_v54 = vld [vmem:[%s1878_s1 + $0xf0] sm:$0xff] }
  0x28   :  { %338 = vmatpush1.msra.mxu0 %v129_v13  ;;  %409 = vmatpush1.msra.mxu1 %v131_v14  ;;  %v42_v55 = vld [vmem:[%s1878_s1 + $0xa8] sm:$0xff]  ;;  %v44_v56 = vld [vmem:[%s1878_s1 + $0xb8] sm:$0xff]  ;;  %v41_v57 = vld [vmem:[%s1878_s1 + $0xa0] sm:$0xff] }
  0x29   :  { %339 = vmatprep.subr.mxu0 %v122_v15  ;;  %410 = vmatprep.subr.mxu1 %v124_v16  ;;  %v43_v58 = vld [vmem:[%s1878_s1 + $0xb0] sm:$0xff]  ;;  %v34_v59 = vld [vmem:[%s1878_s1 + $0x68] sm:$0xff]  ;;  %v36_v60 = vld [vmem:[%s1878_s1 + $0x78] sm:$0xff] }
  0x2a   :  { %340 = vmatpush1.msra.mxu0 %v121_v17  ;;  %411 = vmatpush1.msra.mxu1 %v123_v18  ;;  %v33_v61 = vld [vmem:[%s1878_s1 + $0x60] sm:$0xff]  ;;  %v35_v62 = vld [vmem:[%s1878_s1 + $0x70] sm:$0xff]  ;;  %v26_v63 = vld [vmem:[%s1878_s1 + $0x28] sm:$0xff] }
  0x2b   :  { %341 = vmatprep.subr.mxu0 %v114_v19  ;;  %412 = vmatprep.subr.mxu1 %v116_v20  ;;  %v28_v0 = vld [vmem:[%s1878_s1 + $0x38] sm:$0xff]  ;;  %v25_v2 = vld [vmem:[%s1878_s1 + $0x20] sm:$0xff]  ;;  %v27_v4 = vld [vmem:[%s1878_s1 + $0x30] sm:$0xff] }
  0x2c   :  { %342 = vmatpush1.msra.mxu0 %v113_v21  ;;  %413 = vmatpush1.msra.mxu1 %v115_v22  ;;  %v506_v5 = vld [vmem:[%s1880_s3 + $0xf8] sm:$0xff]  ;;  %v505_v9 = vld [vmem:[%s1880_s3 + $0xf0] sm:$0xff]  ;;  %v536_v12 = vld [vmem:[%s1880_s3 + $0x1e8] sm:$0xff] }
  0x2d   :  { %343 = vmatprep.subr.mxu0 %v106_v23  ;;  %414 = vmatprep.subr.mxu1 %v108_v24  ;;  %v538_v6 = vld [vmem:[%s1880_s3 + $0x1f8] sm:$0xff]  ;;  %v489_v10 = vld [vmem:[%s1880_s3 + $0x70] sm:$0xff]  ;;  %v488_v13 = vld [vmem:[%s1880_s3 + $0x68] sm:$0xff] }
  0x2e   :  { %344 = vmatpush1.msra.mxu0 %v105_v25  ;;  %415 = vmatpush1.msra.mxu1 %v107_v26  ;;  %v490_v7 = vld [vmem:[%s1880_s3 + $0x78] sm:$0xff]  ;;  %v521_v11 = vld [vmem:[%s1880_s3 + $0x170] sm:$0xff]  ;;  %v520_v14 = vld [vmem:[%s1880_s3 + $0x168] sm:$0xff] }
  0x2f   :  { %345 = vmatprep.subr.mxu0 %v98_v27  ;;  %416 = vmatprep.subr.mxu1 %v100_v28  ;;  %v522_v8 = vld [vmem:[%s1880_s3 + $0x178] sm:$0xff]  ;;  %v503_v15 = vld [vmem:[%s1880_s3 + $0xe0] sm:$0xff]  ;;  %v501_v23 = vld [vmem:[%s1880_s3 + $0xd0] sm:$0xff] }
  0x30   :  { %346 = vmatpush1.msra.mxu0 %v97_v29  ;;  %417 = vmatpush1.msra.mxu1 %v99_v30  ;;  %v535_v16 = vld [vmem:[%s1880_s3 + $0x1e0] sm:$0xff]  ;;  %v502_v19 = vld [vmem:[%s1880_s3 + $0xd8] sm:$0xff]  ;;  %v533_v24 = vld [vmem:[%s1880_s3 + $0x1d0] sm:$0xff] }
  0x31   :  { %347 = vmatprep.subr.mxu0 %v90_v31  ;;  %418 = vmatprep.subr.mxu1 %v92_v32  ;;  %v487_v17 = vld [vmem:[%s1880_s3 + $0x60] sm:$0xff]  ;;  %v534_v20 = vld [vmem:[%s1880_s3 + $0x1d8] sm:$0xff]  ;;  %v485_v25 = vld [vmem:[%s1880_s3 + $0x50] sm:$0xff] }
  0x32   :  { %348 = vmatpush1.msra.mxu0 %v89_v33  ;;  %419 = vmatpush1.msra.mxu1 %v91_v34  ;;  %v519_v18 = vld [vmem:[%s1880_s3 + $0x160] sm:$0xff]  ;;  %v486_v21 = vld [vmem:[%s1880_s3 + $0x58] sm:$0xff]  ;;  %v517_v26 = vld [vmem:[%s1880_s3 + $0x150] sm:$0xff] }
  0x33   :  { %349 = vmatprep.subr.mxu0 %v82_v35  ;;  %420 = vmatprep.subr.mxu1 %v84_v36  ;;  %v518_v22 = vld [vmem:[%s1880_s3 + $0x158] sm:$0xff]  ;;  %v500_v27 = vld [vmem:[%s1880_s3 + $0xc8] sm:$0xff]  ;;  %v499_v31 = vld [vmem:[%s1880_s3 + $0xc0] sm:$0xff] }
  0x34   :  { %350 = vmatpush1.msra.mxu0 %v81_v37  ;;  %421 = vmatpush1.msra.mxu1 %v83_v38  ;;  %v532_v28 = vld [vmem:[%s1880_s3 + $0x1c8] sm:$0xff]  ;;  %v531_v32 = vld [vmem:[%s1880_s3 + $0x1c0] sm:$0xff]  ;;  %v498_v35 = vld [vmem:[%s1880_s3 + $0xb8] sm:$0xff] }
  0x35   :  { %351 = vmatprep.subr.mxu0 %v74_v39  ;;  %422 = vmatprep.subr.mxu1 %v76_v40  ;;  %v484_v29 = vld [vmem:[%s1880_s3 + $0x48] sm:$0xff]  ;;  %v483_v33 = vld [vmem:[%s1880_s3 + $0x40] sm:$0xff]  ;;  %v530_v36 = vld [vmem:[%s1880_s3 + $0x1b8] sm:$0xff] }
  0x36   :  { %352 = vmatpush1.msra.mxu0 %v73_v41  ;;  %423 = vmatpush1.msra.mxu1 %v75_v42  ;;  %v516_v30 = vld [vmem:[%s1880_s3 + $0x148] sm:$0xff]  ;;  %v515_v34 = vld [vmem:[%s1880_s3 + $0x140] sm:$0xff]  ;;  %v482_v37 = vld [vmem:[%s1880_s3 + $0x38] sm:$0xff] }
  0x37   :  { %353 = vmatprep.subr.mxu0 %v66_v43  ;;  %424 = vmatprep.subr.mxu1 %v68_v44  ;;  %v514_v38 = vld [vmem:[%s1880_s3 + $0x138] sm:$0xff]  ;;  %v497_v39 = vld [vmem:[%s1880_s3 + $0xb0] sm:$0xff]  ;;  %v496_v43 = vld [vmem:[%s1880_s3 + $0xa8] sm:$0xff] }
  0x38   :  { %354 = vmatpush1.msra.mxu0 %v65_v45  ;;  %425 = vmatpush1.msra.mxu1 %v67_v46  ;;  %v529_v40 = vld [vmem:[%s1880_s3 + $0x1b0] sm:$0xff]  ;;  %v528_v44 = vld [vmem:[%s1880_s3 + $0x1a8] sm:$0xff] }
  0x39   :  { %355 = vmatprep.subr.mxu0 %v58_v47  ;;  %426 = vmatprep.subr.mxu1 %v60_v48  ;;  %v481_v41 = vld [vmem:[%s1880_s3 + $0x30] sm:$0xff]  ;;  %v480_v45 = vld [vmem:[%s1880_s3 + $0x28] sm:$0xff]  ;;  %v495_v47 = vld [vmem:[%s1880_s3 + $0xa0] sm:$0xff] }
  0x3a   :  { %356 = vmatpush1.msra.mxu0 %v57_v49  ;;  %427 = vmatpush1.msra.mxu1 %v59_v50  ;;  %v513_v42 = vld [vmem:[%s1880_s3 + $0x130] sm:$0xff]  ;;  %v512_v46 = vld [vmem:[%s1880_s3 + $0x128] sm:$0xff]  ;;  %v527_v48 = vld [vmem:[%s1880_s3 + $0x1a0] sm:$0xff] }
  0x3b   :  { %357 = vmatprep.subr.mxu0 %v50_v51  ;;  %428 = vmatprep.subr.mxu1 %v52_v52  ;;  %v479_v49 = vld [vmem:[%s1880_s3 + $0x20] sm:$0xff]  ;;  %v494_v51 = vld [vmem:[%s1880_s3 + $0x98] sm:$0xff] }
  0x3c   :  { %358 = vmatpush1.msra.mxu0 %v49_v53  ;;  %429 = vmatpush1.msra.mxu1 %v51_v54  ;;  %v511_v50 = vld [vmem:[%s1880_s3 + $0x120] sm:$0xff]  ;;  %v526_v52 = vld [vmem:[%s1880_s3 + $0x198] sm:$0xff] }
  0x3d   :  { %359 = vmatprep.subr.mxu0 %v42_v55  ;;  %430 = vmatprep.subr.mxu1 %v44_v56  ;;  %v478_v53 = vld [vmem:[%s1880_s3 + $0x18] sm:$0xff]  ;;  %v493_v55 = vld [vmem:[%s1880_s3 + $0x90] sm:$0xff] }
  0x3e   :  { %360 = vmatpush1.msra.mxu0 %v41_v57  ;;  %431 = vmatpush1.msra.mxu1 %v43_v58  ;;  %v510_v54 = vld [vmem:[%s1880_s3 + $0x118] sm:$0xff]  ;;  %v525_v56 = vld [vmem:[%s1880_s3 + $0x190] sm:$0xff] }
  0x3f   :  { %361 = vmatprep.subr.mxu0 %v34_v59  ;;  %432 = vmatprep.subr.mxu1 %v36_v60  ;;  %v477_v57 = vld [vmem:[%s1880_s3 + $0x10] sm:$0xff]  ;;  %v492_v59 = vld [vmem:[%s1880_s3 + $0x88] sm:$0xff] }
  0x40   :  { %362 = vmatpush1.msra.mxu0 %v33_v61  ;;  %433 = vmatpush1.msra.mxu1 %v35_v62  ;;  %v509_v58 = vld [vmem:[%s1880_s3 + $0x110] sm:$0xff]  ;;  %v524_v60 = vld [vmem:[%s1880_s3 + $0x188] sm:$0xff] }
  0x41   :  { %363 = vmatprep.subr.mxu0 %v26_v63  ;;  %434 = vmatprep.subr.mxu1 %v28_v0  ;;  %v476_v61 = vld [vmem:[%s1880_s3 + $0x8] sm:$0xff]  ;;  %v491_v63 = vld [vmem:[%s1880_s3 + $0x80] sm:$0xff] }
  0x42   :  { %364 = vmatpush1.msra.mxu0 %v25_v2  ;;  %397 = vmatprep.mubr.f32.mxu0 %v1037_v3  ;;  %v508_v62 = vld [vmem:[%s1880_s3 + $0x108] sm:$0xff]  ;;  %v523_v0 = vld [vmem:[%s1880_s3 + $0x180] sm:$0xff] }
  0x43   :  { %435 = vmatpush1.msra.mxu1 %v27_v4  ;;  %468 = vmatprep.mubr.f32.mxu1 %v1037_v3  ;;  %v537_v3 = vld [vmem:[%s1880_s3 + $0x1f0] sm:$0xff]  ;;  %v475_v2 = vld [vmem:[%s1880_s3] sm:$0xff] }
  0x44   :  { %398 = vmatmul.mubr.f32.vlgmr.msra.gmra.mxu0 %v1265_v1  ;;  %469 = vmatmul.mubr.f32.vlgmr.msra.gmra.mxu1 %v1265_v1  ;;  %v504_v1 = vld [vmem:[%s1880_s3 + $0xe8] sm:$0xff]  ;;  %v507_v4 = vld [vmem:[%s1880_s3 + $0x100] sm:$0xff] }
  0x45   :  { %896 = vmatprep.subr.mxu0 %v506_v5  ;;  %931 = vmatprep.subr.mxu1 %v538_v6  ;;  %v570_v5 = vld [vmem:[%s1880_s3 + $0x2f8] sm:$0xff] }
  0x46   :  { %897 = vmatpush3.msra.mxu0 %v490_v7  ;;  %932 = vmatpush3.msra.mxu1 %v522_v8  ;;  %v602_v6 = vld [vmem:[%s1880_s3 + $0x3f8] sm:$0xff]  ;;  %v151_v7 = vlaneseq }
  0x47   :  { %898 = vmatprep.subr.mxu0 %v505_v9  ;;  %933 = vmatprep.subr.mxu1 %v537_v3 }
  0x48   :  { %899 = vmatpush3.msra.mxu0 %v489_v10  ;;  %934 = vmatpush3.msra.mxu1 %v521_v11  ;;  %v1663_v8 = vshrl.u32 %v151_v7, 7  ;;  %v1671_v11 = vld [vmem:[%s1881_s2] sm:$0xff] }
  0x49   :  { %900 = vmatprep.subr.mxu0 %v504_v1  ;;  %935 = vmatprep.subr.mxu1 %v536_v12  ;;  %v575_v7 = vld [vmem:[%s1880_s3 + $0x320] sm:$0xff] }
  0x4a   :  { %901 = vmatpush3.msra.mxu0 %v488_v13  ;;  %936 = vmatpush3.msra.mxu1 %v520_v14  ;;  %v161_v9 = vsub.s32 2, %v1663_v8  ;;  %v157_v3 = vsub.s32 1, %v1663_v8  ;;  %v165_v10 = vsub.s32 3, %v1663_v8  ;;  %v153_v1 = vsub.s32 0, %v1663_v8 }
  0x4b   :  { %902 = vmatprep.subr.mxu0 %v503_v15  ;;  %937 = vmatprep.subr.mxu1 %v535_v16 }
  0x4c   :  { %903 = vmatpush3.msra.mxu0 %v487_v17  ;;  %938 = vmatpush3.msra.mxu1 %v519_v18  ;;  %v162_v12 = vrot.slane %v1671_v11, %v161_v9  ;;  %v158_v13 = vrot.slane %v1671_v11, %v157_v3  ;;  %v166_v14 = vrot.slane %v1671_v11, %v165_v10  ;;  %v558_v9 = vld [vmem:[%s1880_s3 + $0x298] sm:$0xff] }
  0x4d   :  { %904 = vmatprep.subr.mxu0 %v502_v19  ;;  %939 = vmatprep.subr.mxu1 %v534_v20  ;;  %v154_v15 = vrot.slane %v1671_v11, %v153_v1  ;;  %v590_v3 = vld [vmem:[%s1880_s3 + $0x398] sm:$0xff] }
  0x4e   :  { %905 = vmatpush3.msra.mxu0 %v486_v21  ;;  %940 = vmatpush3.msra.mxu1 %v518_v22  ;;  %v542_v10 = vld [vmem:[%s1880_s3 + $0x218] sm:$0xff] }
  0x4f   :  { %906 = vmatprep.subr.mxu0 %v501_v23  ;;  %941 = vmatprep.subr.mxu1 %v533_v24  ;;  %v554_v24 = vld [vmem:[%s1880_s3 + $0x278] sm:$0xff] }
  0x50   :  { %907 = vmatpush3.msra.mxu0 %v485_v25  ;;  %942 = vmatpush3.msra.mxu1 %v517_v26  ;;  %v586_v25 = vld [vmem:[%s1880_s3 + $0x378] sm:$0xff]  ;;  %v569_v26 = vld [vmem:[%s1880_s3 + $0x2f0] sm:$0xff] }
  0x51   :  { %908 = vmatprep.subr.mxu0 %v500_v27  ;;  %943 = vmatprep.subr.mxu1 %v532_v28  ;;  %v601_v27 = vld [vmem:[%s1880_s3 + $0x3f0] sm:$0xff]  ;;  %v574_v1 = vld [vmem:[%s1880_s3 + $0x318] sm:$0xff] }
  0x52   :  { %909 = vmatpush3.msra.mxu0 %v484_v29  ;;  %944 = vmatpush3.msra.mxu1 %v516_v30  ;;  %v553_v28 = vld [vmem:[%s1880_s3 + $0x270] sm:$0xff]  ;;  %v568_v30 = vld [vmem:[%s1880_s3 + $0x2e8] sm:$0xff] }
  0x53   :  { %910 = vmatprep.subr.mxu0 %v499_v31  ;;  %945 = vmatprep.subr.mxu1 %v531_v32  ;;  %v585_v29 = vld [vmem:[%s1880_s3 + $0x370] sm:$0xff]  ;;  %v600_v31 = vld [vmem:[%s1880_s3 + $0x3e8] sm:$0xff] }
  0x54   :  { %911 = vmatpush3.msra.mxu0 %v483_v33  ;;  %946 = vmatpush3.msra.mxu1 %v515_v34  ;;  %v552_v32 = vld [vmem:[%s1880_s3 + $0x268] sm:$0xff]  ;;  %v567_v34 = vld [vmem:[%s1880_s3 + $0x2e0] sm:$0xff] }
  0x55   :  { %912 = vmatprep.subr.mxu0 %v498_v35  ;;  %947 = vmatprep.subr.mxu1 %v530_v36  ;;  %v584_v33 = vld [vmem:[%s1880_s3 + $0x368] sm:$0xff]  ;;  %v599_v35 = vld [vmem:[%s1880_s3 + $0x3e0] sm:$0xff] }
  0x56   :  { %913 = vmatpush3.msra.mxu0 %v482_v37  ;;  %948 = vmatpush3.msra.mxu1 %v514_v38  ;;  %v551_v36 = vld [vmem:[%s1880_s3 + $0x260] sm:$0xff]  ;;  %v566_v38 = vld [vmem:[%s1880_s3 + $0x2d8] sm:$0xff] }
  0x57   :  { %914 = vmatprep.subr.mxu0 %v497_v39  ;;  %949 = vmatprep.subr.mxu1 %v529_v40  ;;  %v583_v37 = vld [vmem:[%s1880_s3 + $0x360] sm:$0xff]  ;;  %v598_v39 = vld [vmem:[%s1880_s3 + $0x3d8] sm:$0xff] }
  0x58   :  { %915 = vmatpush3.msra.mxu0 %v481_v41  ;;  %950 = vmatpush3.msra.mxu1 %v513_v42  ;;  %v550_v40 = vld [vmem:[%s1880_s3 + $0x258] sm:$0xff]  ;;  %v565_v42 = vld [vmem:[%s1880_s3 + $0x2d0] sm:$0xff] }
  0x59   :  { %916 = vmatprep.subr.mxu0 %v496_v43  ;;  %951 = vmatprep.subr.mxu1 %v528_v44  ;;  %v582_v41 = vld [vmem:[%s1880_s3 + $0x358] sm:$0xff]  ;;  %v597_v43 = vld [vmem:[%s1880_s3 + $0x3d0] sm:$0xff] }
  0x5a   :  { %917 = vmatpush3.msra.mxu0 %v480_v45  ;;  %952 = vmatpush3.msra.mxu1 %v512_v46  ;;  %v549_v44 = vld [vmem:[%s1880_s3 + $0x250] sm:$0xff]  ;;  %v564_v46 = vld [vmem:[%s1880_s3 + $0x2c8] sm:$0xff] }
  0x5b   :  { %918 = vmatprep.subr.mxu0 %v495_v47  ;;  %953 = vmatprep.subr.mxu1 %v527_v48  ;;  %v581_v45 = vld [vmem:[%s1880_s3 + $0x350] sm:$0xff]  ;;  %v596_v47 = vld [vmem:[%s1880_s3 + $0x3c8] sm:$0xff] }
  0x5c   :  { %919 = vmatpush3.msra.mxu0 %v479_v49  ;;  %954 = vmatpush3.msra.mxu1 %v511_v50  ;;  %v548_v48 = vld [vmem:[%s1880_s3 + $0x248] sm:$0xff]  ;;  %v563_v50 = vld [vmem:[%s1880_s3 + $0x2c0] sm:$0xff] }
  0x5d   :  { %920 = vmatprep.subr.mxu0 %v494_v51  ;;  %955 = vmatprep.subr.mxu1 %v526_v52  ;;  %v580_v49 = vld [vmem:[%s1880_s3 + $0x348] sm:$0xff]  ;;  %v595_v51 = vld [vmem:[%s1880_s3 + $0x3c0] sm:$0xff] }
  0x5e   :  { %921 = vmatpush3.msra.mxu0 %v478_v53  ;;  %956 = vmatpush3.msra.mxu1 %v510_v54  ;;  %v547_v52 = vld [vmem:[%s1880_s3 + $0x240] sm:$0xff]  ;;  %v562_v54 = vld [vmem:[%s1880_s3 + $0x2b8] sm:$0xff] }
  0x5f   :  { %922 = vmatprep.subr.mxu0 %v493_v55  ;;  %957 = vmatprep.subr.mxu1 %v525_v56  ;;  %v579_v53 = vld [vmem:[%s1880_s3 + $0x340] sm:$0xff]  ;;  %v594_v55 = vld [vmem:[%s1880_s3 + $0x3b8] sm:$0xff] }
  0x60   :  { %923 = vmatpush3.msra.mxu0 %v477_v57  ;;  %958 = vmatpush3.msra.mxu1 %v509_v58  ;;  %v546_v56 = vld [vmem:[%s1880_s3 + $0x238] sm:$0xff]  ;;  %v561_v58 = vld [vmem:[%s1880_s3 + $0x2b0] sm:$0xff] }
  0x61   :  { %924 = vmatprep.subr.mxu0 %v492_v59  ;;  %959 = vmatprep.subr.mxu1 %v524_v60  ;;  %v578_v57 = vld [vmem:[%s1880_s3 + $0x338] sm:$0xff]  ;;  %v593_v59 = vld [vmem:[%s1880_s3 + $0x3b0] sm:$0xff] }
  0x62   :  { %925 = vmatpush3.msra.mxu0 %v476_v61  ;;  %960 = vmatpush3.msra.mxu1 %v508_v62  ;;  %v545_v60 = vld [vmem:[%s1880_s3 + $0x230] sm:$0xff]  ;;  %v560_v62 = vld [vmem:[%s1880_s3 + $0x2a8] sm:$0xff] }
  0x63   :  { %926 = vmatprep.subr.mxu0 %v491_v63  ;;  %961 = vmatprep.subr.mxu1 %v523_v0  ;;  %v577_v61 = vld [vmem:[%s1880_s3 + $0x330] sm:$0xff]  ;;  %v592_v63 = vld [vmem:[%s1880_s3 + $0x3a8] sm:$0xff] }
  0x64   :  { %927 = vmatpush3.msra.mxu0 %v475_v2  ;;  %962 = vmatpush3.msra.mxu1 %v507_v4  ;;  %v544_v0 = vld [vmem:[%s1880_s3 + $0x228] sm:$0xff]  ;;  %v559_v4 = vld [vmem:[%s1880_s3 + $0x2a0] sm:$0xff] }
  0x65   :  { %966 = vmatprep.subr.mxu0 %v570_v5  ;;  %1001 = vmatprep.subr.mxu1 %v602_v6  ;;  %v576_v2 = vld [vmem:[%s1880_s3 + $0x328] sm:$0xff]  ;;  %v591_v5 = vld [vmem:[%s1880_s3 + $0x3a0] sm:$0xff] }
  0x66   :  { %v543_v6 = vld [vmem:[%s1880_s3 + $0x220] sm:$0xff] }
  0xe2   :  { %v257_v16 = vpop.f32.mrf.mxu0  ;;  %v328_v17 = vpop.f32.mrf.mxu1 }
  0xe3   :  { %v329_v18 = vadd.f32 %v328_v17, %v162_v12  ;;  %v258_v23 = vadd.f32 %v257_v16, %v154_v15  ;;  %v177_v12 = vsub.s32 6, %v1663_v8  ;;  %v173_v15 = vsub.s32 5, %v1663_v8 }
  0xe4   :  { %v259_v19 = vpop.f32.mrf.mxu0  ;;  %v330_v20 = vpop.f32.mrf.mxu1  ;;  %v181_v16 = vsub.s32 7, %v1663_v8  ;;  %v169_v17 = vsub.s32 4, %v1663_v8 }
  0xe5   :  { %v260_v21 = vadd.f32 %v259_v19, %v158_v13  ;;  %v331_v22 = vadd.f32 %v330_v20, %v166_v14  ;;  %v557_v13 = vld [vmem:[%s1880_s3 + $0x290] sm:$0xff]  ;;  %v556_v20 = vld [vmem:[%s1880_s3 + $0x288] sm:$0xff]  ;;  %v178_v8 = vrot.slane %v1671_v11, %v177_v12 }
  0xe6   :  { %v589_v14 = vld [vmem:[%s1880_s3 + $0x390] sm:$0xff] }
  0xe7   :  { %674 = vmatprep.mubr.f32.mxu0 %v260_v21  ;;  %744 = vmatprep.mubr.f32.mxu1 %v331_v22  ;;  %v573_v19 = vld [vmem:[%s1880_s3 + $0x310] sm:$0xff]  ;;  %v588_v21 = vld [vmem:[%s1880_s3 + $0x388] sm:$0xff] }
  0xe8   :  { %675 = vmatmul.mubr.f32.vlgmr.msra.gmra.mxu0 %v258_v23  ;;  %745 = vmatmul.mubr.f32.vlgmr.msra.gmra.mxu1 %v329_v18  ;;  %v541_v18 = vld [vmem:[%s1880_s3 + $0x210] sm:$0xff]  ;;  %v540_v22 = vld [vmem:[%s1880_s3 + $0x208] sm:$0xff] }
  0xe9   :  { %967 = vmatpush3.msra.mxu0 %v554_v24  ;;  %1002 = vmatpush3.msra.mxu1 %v586_v25  ;;  %v572_v23 = vld [vmem:[%s1880_s3 + $0x308] sm:$0xff]  ;;  %v174_v24 = vrot.slane %v1671_v11, %v173_v15  ;;  %v182_v25 = vrot.slane %v1671_v11, %v181_v16 }
  0xea   :  { %968 = vmatprep.subr.mxu0 %v569_v26  ;;  %1003 = vmatprep.subr.mxu1 %v601_v27  ;;  %v555_v26 = vld [vmem:[%s1880_s3 + $0x280] sm:$0xff] }
  0xeb   :  { %969 = vmatpush3.msra.mxu0 %v553_v28  ;;  %1004 = vmatpush3.msra.mxu1 %v585_v29  ;;  %v587_v27 = vld [vmem:[%s1880_s3 + $0x380] sm:$0xff]  ;;  %v170_v28 = vrot.slane %v1671_v11, %v169_v17 }
  0xec   :  { %970 = vmatprep.subr.mxu0 %v568_v30  ;;  %1005 = vmatprep.subr.mxu1 %v600_v31  ;;  %v539_v31 = vld [vmem:[%s1880_s3 + $0x200] sm:$0xff] }
  0xed   :  { %971 = vmatpush3.msra.mxu0 %v552_v32  ;;  %1006 = vmatpush3.msra.mxu1 %v584_v33  ;;  %v571_v32 = vld [vmem:[%s1880_s3 + $0x300] sm:$0xff] }
  0xee   :  { %972 = vmatprep.subr.mxu0 %v567_v34  ;;  %1007 = vmatprep.subr.mxu1 %v599_v35 }
  0xef   :  { %973 = vmatpush3.msra.mxu0 %v551_v36  ;;  %1008 = vmatpush3.msra.mxu1 %v583_v37 }
  0xf0   :  { %974 = vmatprep.subr.mxu0 %v566_v38  ;;  %1009 = vmatprep.subr.mxu1 %v598_v39 }
  0xf1   :  { %975 = vmatpush3.msra.mxu0 %v550_v40  ;;  %1010 = vmatpush3.msra.mxu1 %v582_v41 }
  0xf2   :  { %976 = vmatprep.subr.mxu0 %v565_v42  ;;  %1011 = vmatprep.subr.mxu1 %v597_v43  ;;  %v895_v42 = vld [vmem:[%s1882_s4] ss:$0 sm:$0xff] }
  0xf3   :  { %977 = vmatpush3.msra.mxu0 %v549_v44  ;;  %1012 = vmatpush3.msra.mxu1 %v581_v45 }
  0xf4   :  { %978 = vmatprep.subr.mxu0 %v564_v46  ;;  %1013 = vmatprep.subr.mxu1 %v596_v47 }
  0xf5   :  { %979 = vmatpush3.msra.mxu0 %v548_v48  ;;  %1014 = vmatpush3.msra.mxu1 %v580_v49 }
  0xf6   :  { %980 = vmatprep.subr.mxu0 %v563_v50  ;;  %1015 = vmatprep.subr.mxu1 %v595_v51 }
  0xf7   :  { %981 = vmatpush3.msra.mxu0 %v547_v52  ;;  %1016 = vmatpush3.msra.mxu1 %v579_v53 }
  0xf8   :  { %982 = vmatprep.subr.mxu0 %v562_v54  ;;  %1017 = vmatprep.subr.mxu1 %v594_v55 }
  0xf9   :  { %983 = vmatpush3.msra.mxu0 %v546_v56  ;;  %1018 = vmatpush3.msra.mxu1 %v578_v57 }
  0xfa   :  { %984 = vmatprep.subr.mxu0 %v561_v58  ;;  %1019 = vmatprep.subr.mxu1 %v593_v59 }
  0xfb   :  { %985 = vmatpush3.msra.mxu0 %v545_v60  ;;  %1020 = vmatpush3.msra.mxu1 %v577_v61 }
  0xfc   :  { %986 = vmatprep.subr.mxu0 %v560_v62  ;;  %1021 = vmatprep.subr.mxu1 %v592_v63 }
  0xfd   :  { %987 = vmatpush3.msra.mxu0 %v544_v0  ;;  %1022 = vmatpush3.msra.mxu1 %v576_v2 }
  0xfe   :  { %988 = vmatprep.subr.mxu0 %v559_v4  ;;  %1023 = vmatprep.subr.mxu1 %v591_v5 }
  0xff   :  { %989 = vmatpush3.msra.mxu0 %v543_v6  ;;  %1024 = vmatpush3.msra.mxu1 %v575_v7 }
 0x100   :  { %990 = vmatprep.subr.mxu0 %v558_v9  ;;  %1025 = vmatprep.subr.mxu1 %v590_v3 }
 0x101   :  { %991 = vmatpush3.msra.mxu0 %v542_v10  ;;  %1026 = vmatpush3.msra.mxu1 %v574_v1 }
 0x102   :  { %992 = vmatprep.subr.mxu0 %v557_v13  ;;  %1027 = vmatprep.subr.mxu1 %v589_v14 }
 0x103   :  { %993 = vmatpush3.msra.mxu0 %v541_v18  ;;  %1028 = vmatpush3.msra.mxu1 %v573_v19 }
 0x104   :  { %v399_v29 = vpop.f32.mrf.mxu0  ;;  %v470_v30 = vpop.f32.mrf.mxu1  ;;  %994 = vmatprep.subr.mxu0 %v556_v20  ;;  %1029 = vmatprep.subr.mxu1 %v588_v21 }
 0x105   :  { %995 = vmatpush3.msra.mxu0 %v540_v22  ;;  %1030 = vmatpush3.msra.mxu1 %v572_v23  ;;  %v471_v33 = vadd.f32 %v470_v30, %v178_v8  ;;  %v400_v37 = vadd.f32 %v399_v29, %v170_v28 }
 0x106   :  { %v401_v34 = vpop.f32.mrf.mxu0  ;;  %v472_v35 = vpop.f32.mrf.mxu1  ;;  %996 = vmatprep.subr.mxu0 %v555_v26  ;;  %1031 = vmatprep.subr.mxu1 %v587_v27 }
 0x107   :  { %v402_v11 = vadd.f32 %v401_v34, %v174_v24  ;;  %v473_v36 = vadd.f32 %v472_v35, %v182_v25  ;;  %997 = vmatpush3.msra.mxu0 %v539_v31  ;;  %1032 = vmatpush3.msra.mxu1 %v571_v32 }
 0x109   :  { %814 = vmatprep.mubr.f32.mxu0 %v402_v11  ;;  %884 = vmatprep.mubr.f32.mxu1 %v473_v36 }
 0x10a   :  { %815 = vmatmul.mubr.f32.vlgmr.msra.gmra.mxu0 %v400_v37  ;;  %885 = vmatmul.mubr.f32.vlgmr.msra.gmra.mxu1 %v471_v33 }
 0x1a8   :  { %v928_v38 = vpop.f32.mrf.mxu0  ;;  %v963_v40 = vpop.f32.mrf.mxu1 }
 0x1aa   :  { %v929_v39 = vpop.f32.mrf.mxu0  ;;  %v964_v43 = vpop.f32.mrf.mxu1 }
 0x1ab   :  { %v930_v41 = vadd.f32 %v929_v39, %v928_v38  ;;  %v965_v47 = vadd.f32 %v964_v43, %v963_v40 }
 0x1ad   :  { %v677_v44 = vadd.f32 %v930_v41, %v895_v42 }
 0x1af   :  { %v747_v50 = vadd.f32 %v965_v47, %v677_v44 }
 0x1ca   :  { %v998_v45 = vpop.f32.mrf.mxu0  ;;  %v1033_v46 = vpop.f32.mrf.mxu1 }
 0x1cc   :  { %v999_v48 = vpop.f32.mrf.mxu0  ;;  %v1034_v49 = vpop.f32.mrf.mxu1 }
 0x1cd   :  { %v1000_v51 = vadd.f32 %v999_v48, %v998_v45  ;;  %v1035_v53 = vadd.f32 %v1034_v49, %v1033_v46 }
 0x1cf   :  { %v817_v52 = vadd.f32 %v1000_v51, %v747_v50 }
 0x1d1   :  { %v887_v54 = vadd.f32 %v1035_v53, %v817_v52 }
 0x1d3   :  { %890 = vst [vmem:[%s1883_s5] sm:$0x3] %v887_v54 }

</bundles_post_ra>
